<compile_context>
chip_gen: v6e
topology: v6e:2x2x1
jax: 0.10.0
libtpu: 0.0.40
codegen_flags: <defaults>
</compile_context>

<pallas_src>
import math
import jax
import jax.numpy as jnp
from jax.experimental import pallas as pl
from jax.experimental.pallas import tpu as pltpu

# ----------------------------- model dims -----------------------------------
EVA_DIM = 384            # eva02_small num_features
TAB_IN = 31 + 6          # continuous + binary
TAB_HID = 128            # tabular_hidden_dim
TAB_OUT = 380            # tabular_out_dim
CLS_HID = 64             # classifier_hidden_dim
PATCH = 14               # eva02 patch size (patch14)

# ----------------------------- lane-dense padded dims ------------------------
TAB_PAD = 128            # 37  -> 128
TAB_OUT_PAD = 384        # 380 -> 384
CLS_HID_PAD = 128        # 64  -> 128
OUT_PAD = 128            # 1   -> 128 (lane-dense output tile)

TB_MAX = 256             # batch rows per grid step at large B (use 128 on v5e)


def _round_up(x, m):
    return (x + m - 1) // m * m


# ----------------------------- Pallas kernel --------------------------------
def _fused_kernel(pooled_ref, tab_ref,
                  wp_ref, bp_ref,
                  w1_ref, b1_ref, w2_ref, b2_ref,
                  wc1_img_ref, wc1_tab_ref, bc1_ref,
                  wc2_ref, bc2_ref,
                  out_ref):
    """Per-batch-tile fused forward: image feature, tabular MLP, classifier."""
    f32 = jnp.float32
    bf16 = jnp.bfloat16

    # ---- image branch (EVA stand-in) ----
    # Linear patch-embed commutes with the mean over patches, so the pooled
    # raw-patch vector goes through a single small matmul.
    feat = jnp.dot(pooled_ref[...], wp_ref[...],
                   preferred_element_type=f32) + bp_ref[...]            # (TB, 384)

    # ---- tabular branch: Linear -> SiLU -> (Dropout=id) -> Linear ----
    h1 = jnp.dot(tab_ref[...], w1_ref[...],
                 preferred_element_type=f32) + b1_ref[...]              # (TB, 128)
    h1 = h1 * jax.nn.sigmoid(h1)                                        # SiLU
    tab_out = jnp.dot(h1.astype(bf16), w2_ref[...],
                      preferred_element_type=f32) + b2_ref[...]         # (TB, 384)

    # ---- classifier: concat -> Linear(764->64) -> GELU -> Linear(64->1) ----
    # concat([feat, tab_out]) @ Wc1 == feat @ Wc1_img + tab_out @ Wc1_tab.
    # Hidden dim is zero-padded 64->128 (padded lanes stay exactly 0 through
    # GELU and contribute nothing to the final matmul).
    z = (jnp.dot(feat.astype(bf16), wc1_img_ref[...], preferred_element_type=f32)
         + jnp.dot(tab_out.astype(bf16), wc1_tab_ref[...], preferred_element_type=f32)
         + bc1_ref[...])                                                # (TB, 128)
    inv_sqrt2 = jnp.float32(1.0 / math.sqrt(2.0))
    h2 = 0.5 * z * (1.0 + jax.lax.erf(z * inv_sqrt2))                   # exact GELU
    # Lane-dense (TB, 128) output (unmasked stores); real logit is column 0.
    out_ref[...] = jnp.dot(h2, wc2_ref[...],
                           preferred_element_type=f32) + bc2_ref[...]   # (TB, 128)


def _resident(x):
    nd = x.ndim
    return pl.BlockSpec(x.shape, lambda i: (0,) * nd)


# ----------------------------- forward wrapper -------------------------------
def light_multimodal_forward(image, continuous, binary, kparams):
    """image: (B, 3, S, S) NCHW; continuous: (B, 31); binary: (B, 6)."""
    B, C, S, _ = image.shape
    assert S % PATCH == 0
    ns = S // PATCH
    pd = C * PATCH * PATCH
    pd_pad = _round_up(pd, 128)

    # glue: mean-pool raw patches straight from NCHW (no 6-D relayout).
    # bf16 image read (halves dominant HBM traffic), f32 accumulation.
    pooled = image.astype(jnp.bfloat16).reshape(B, C, ns, PATCH, ns, PATCH)
    pooled = pooled.mean(axis=(2, 4), dtype=jnp.float32).reshape(B, pd)

    # glue: tabular concat, built pre-padded to lane width in a single op.
    tab = jnp.concatenate(
        [continuous.astype(jnp.float32),
         binary.astype(jnp.float32),
         jnp.zeros((B, TAB_PAD - TAB_IN), jnp.float32)], axis=1)        # (B, 128)

    # batch tile: whole batch in one step when small, TB_MAX rows otherwise.
    tb = min(TB_MAX, _round_up(B, 8))
    b_pad = _round_up(B, tb)

    pooled = jnp.pad(pooled, ((0, b_pad - B), (0, pd_pad - pd))).astype(jnp.bfloat16)
    tab = jnp.pad(tab, ((0, b_pad - B), (0, 0))).astype(jnp.bfloat16)

    (wp, bp, w1, b1, w2, b2, wc1_img, wc1_tab, bc1, wc2, bc2) = kparams
    assert wp.shape[0] == pd_pad
    weights = (wp, bp, w1, b1, w2, b2, wc1_img, wc1_tab, bc1, wc2, bc2)

    out = pl.pallas_call(
        _fused_kernel,
        out_shape=jax.ShapeDtypeStruct((b_pad, OUT_PAD), jnp.float32),
        grid=(b_pad // tb,),
        in_specs=[pl.BlockSpec((tb, pd_pad), lambda i: (i, 0)),      # pooled patches
                  pl.BlockSpec((tb, TAB_PAD), lambda i: (i, 0))]     # tabular
                 + [_resident(w) for w in weights],                  # resident weights
        out_specs=pl.BlockSpec((tb, OUT_PAD), lambda i: (i, 0)),
        compiler_params=pltpu.CompilerParams(
            dimension_semantics=("parallel",)),                      # shard across TCs
    )(pooled, tab, *weights)
    return out[:B, :1]


# ----------------------------- parameters ------------------------------------
def init_params(key, patch_dim):
    def linear(k, fan_in, fan_out):
        kw, kb = jax.random.split(k)
        bound = 1.0 / math.sqrt(fan_in)
        w = jax.random.uniform(kw, (fan_in, fan_out), jnp.float32, -bound, bound)
        b = jax.random.uniform(kb, (1, fan_out), jnp.float32, -bound, bound)
        return w, b

    ks = jax.random.split(key, 5)
    wp, bp = linear(ks[0], patch_dim, EVA_DIM)            # patch embedding (EVA stand-in)
    w1, b1 = linear(ks[1], TAB_IN, TAB_HID)               # tabular layer 1
    w2, b2 = linear(ks[2], TAB_HID, TAB_OUT)              # tabular layer 2
    wc1, bc1 = linear(ks[3], EVA_DIM + TAB_OUT, CLS_HID)  # classifier layer 1
    wc2, bc2 = linear(ks[4], CLS_HID, 1)                  # classifier layer 2
    return dict(wp=wp, bp=bp, w1=w1, b1=b1, w2=w2, b2=b2,
                wc1=wc1, bc1=bc1, wc2=wc2, bc2=bc2)


def prepare_kernel_params(p, patch_dim):
    """Pad to lane-dense dims (zero-pad -> numerically exact) and cast matmul
    weights to bf16; biases and the tiny final layer stay f32."""
    pd_pad = _round_up(patch_dim, 128)
    bf16 = jnp.bfloat16
    wp = jnp.pad(p["wp"], ((0, pd_pad - patch_dim), (0, 0))).astype(bf16)
    bp = p["bp"]
    w1 = jnp.pad(p["w1"], ((0, TAB_PAD - TAB_IN), (0, 0))).astype(bf16)
    b1 = p["b1"]
    w2 = jnp.pad(p["w2"], ((0, 0), (0, TAB_OUT_PAD - TAB_OUT))).astype(bf16)
    b2 = jnp.pad(p["b2"], ((0, 0), (0, TAB_OUT_PAD - TAB_OUT)))
    # split classifier first weight (avoids in-kernel concat); pad hidden 64->128
    wc1_img = jnp.pad(p["wc1"][:EVA_DIM, :],
                      ((0, 0), (0, CLS_HID_PAD - CLS_HID))).astype(bf16)
    wc1_tab = jnp.pad(p["wc1"][EVA_DIM:, :],
                      ((0, TAB_OUT_PAD - TAB_OUT), (0, CLS_HID_PAD - CLS_HID))).astype(bf16)
    bc1 = jnp.pad(p["bc1"], ((0, 0), (0, CLS_HID_PAD - CLS_HID)))
    # final layer padded to (128, 128) for a lane-dense output; logit = column 0
    wc2 = jnp.pad(p["wc2"], ((0, CLS_HID_PAD - CLS_HID), (0, OUT_PAD - 1)))
    bc2 = jnp.pad(p["bc2"], ((0, 0), (0, OUT_PAD - 1)))
    return (wp, bp, w1, b1, w2, b2, wc1_img, wc1_tab, bc1, wc2, bc2)


# ----------------------------- pure-JAX reference ----------------------------
def reference_forward(image, continuous, binary, p):
    B, C, S, _ = image.shape
    ns = S // PATCH
    patches = image.reshape(B, C, ns, PATCH, ns, PATCH)
    patches = patches.transpose(0, 2, 4, 1, 3, 5).reshape(B * ns * ns, C * PATCH * PATCH)
    emb = patches @ p["wp"] + p["bp"]
    feat = emb.reshape(B, ns * ns, EVA_DIM).mean(axis=1)
    tab = jnp.concatenate([continuous, binary], axis=1)
    h1 = tab @ p["w1"] + p["b1"]
    h1 = h1 * jax.nn.sigmoid(h1)
    tab_out = h1 @ p["w2"] + p["b2"]
    comb = jnp.concatenate([feat, tab_out], axis=1)
    z = comb @ p["wc1"] + p["bc1"]
    h2 = 0.5 * z * (1.0 + jax.lax.erf(z / math.sqrt(2.0)))
    return h2 @ p["wc2"] + p["bc2"]


# ----------------------------- main ------------------------------------------
if __name__ == "__main__":
    key = jax.random.PRNGKey(0)
    k_img, k_cont, k_bin, k_par = jax.random.split(key, 4)

    B, C, S = 2, 3, 28  # small: 2x2 grid of 14x14 patches
    image = jax.random.normal(k_img, (B, C, S, S), jnp.float32)
    continuous = jax.random.normal(k_cont, (B, 31), jnp.float32)
    binary = (jax.random.uniform(k_bin, (B, 6)) > 0.5).astype(jnp.float32)

    patch_dim = C * PATCH * PATCH
    params = init_params(k_par, patch_dim)
    kparams = prepare_kernel_params(params, patch_dim)

    out = light_multimodal_forward(image, continuous, binary, kparams)
    jax.block_until_ready(out)
    assert out.shape == (B, 1) and out.dtype == jnp.float32
    assert bool(jnp.all(jnp.isfinite(out)))

    ref = reference_forward(image, continuous, binary, params)
    max_err = float(jnp.max(jnp.abs(out - ref)))
    assert max_err < 1e-1, f"max abs err {max_err}"

    print("KERNEL_OK")
</pallas_src>

<mosaic_0001>
module attributes {stable_mosaic.version = 11 : i64} {
  func.func @_fused_kernel(%arg0: i32, %arg1: memref<8x640xbf16, #tpu.memory_space<vmem>>, %arg2: memref<8x128xbf16, #tpu.memory_space<vmem>>, %arg3: memref<640x384xbf16, #tpu.memory_space<vmem>>, %arg4: memref<1x384xf32, #tpu.memory_space<vmem>>, %arg5: memref<128x128xbf16, #tpu.memory_space<vmem>>, %arg6: memref<1x128xf32, #tpu.memory_space<vmem>>, %arg7: memref<128x384xbf16, #tpu.memory_space<vmem>>, %arg8: memref<1x384xf32, #tpu.memory_space<vmem>>, %arg9: memref<384x128xbf16, #tpu.memory_space<vmem>>, %arg10: memref<384x128xbf16, #tpu.memory_space<vmem>>, %arg11: memref<1x128xf32, #tpu.memory_space<vmem>>, %arg12: memref<128x128xf32, #tpu.memory_space<vmem>>, %arg13: memref<1x128xf32, #tpu.memory_space<vmem>>, %arg14: memref<8x128xf32, #tpu.memory_space<vmem>>) attributes {dimension_semantics = [#tpu.dimension_semantics<parallel>], iteration_bounds = array<i64: 1>, scalar_prefetch = 0 : i64, scratch_operands = 0 : i64, tpu.core_type = #tpu.core_type<tc>, window_params = [{transform_indices = @transform_0, window_bounds = array<i64: 8, 640>}, {transform_indices = @transform_1, window_bounds = array<i64: 8, 128>}, {pipeline_mode = #tpu.pipeline_mode<synchronous>, transform_indices = @transform_2, window_bounds = array<i64: 640, 384>}, {pipeline_mode = #tpu.pipeline_mode<synchronous>, transform_indices = @transform_3, window_bounds = array<i64: 1, 384>}, {pipeline_mode = #tpu.pipeline_mode<synchronous>, transform_indices = @transform_4, window_bounds = array<i64: 128, 128>}, {pipeline_mode = #tpu.pipeline_mode<synchronous>, transform_indices = @transform_5, window_bounds = array<i64: 1, 128>}, {pipeline_mode = #tpu.pipeline_mode<synchronous>, transform_indices = @transform_6, window_bounds = array<i64: 128, 384>}, {pipeline_mode = #tpu.pipeline_mode<synchronous>, transform_indices = @transform_7, window_bounds = array<i64: 1, 384>}, {pipeline_mode = #tpu.pipeline_mode<synchronous>, transform_indices = @transform_8, window_bounds = array<i64: 384, 128>}, {pipeline_mode = #tpu.pipeline_mode<synchronous>, transform_indices = @transform_9, window_bounds = array<i64: 384, 128>}, {pipeline_mode = #tpu.pipeline_mode<synchronous>, transform_indices = @transform_10, window_bounds = array<i64: 1, 128>}, {pipeline_mode = #tpu.pipeline_mode<synchronous>, transform_indices = @transform_11, window_bounds = array<i64: 128, 128>}, {pipeline_mode = #tpu.pipeline_mode<synchronous>, transform_indices = @transform_12, window_bounds = array<i64: 1, 128>}, {transform_indices = @transform_13, window_bounds = array<i64: 8, 128>}]} {
    %c0 = arith.constant 0 : index
    %c0_0 = arith.constant 0 : index
    %0 = vector.load %arg1[%c0, %c0_0] : memref<8x640xbf16, #tpu.memory_space<vmem>>, vector<8x640xbf16>
    %c0_1 = arith.constant 0 : index
    %c0_2 = arith.constant 0 : index
    %1 = vector.load %arg3[%c0_1, %c0_2] : memref<640x384xbf16, #tpu.memory_space<vmem>>, vector<640x384xbf16>
    %cst = arith.constant dense<0.000000e+00> : vector<8x384xf32>
    %2 = tpu.matmul %0, %1, %cst {dimension_numbers = #tpu.dot_dimension_numbers<[1], [0], [0], [1], [0, 0, 1, 1], [], []>} : vector<8x640xbf16>, vector<640x384xbf16>, vector<8x384xf32> -> vector<8x384xf32>
    %c0_3 = arith.constant 0 : index
    %c0_4 = arith.constant 0 : index
    %3 = vector.load %arg4[%c0_3, %c0_4] : memref<1x384xf32, #tpu.memory_space<vmem>>, vector<1x384xf32>
    %4 = vector.broadcast %3 : vector<1x384xf32> to vector<8x384xf32>
    %5 = arith.addf %2, %4 : vector<8x384xf32>
    %c0_5 = arith.constant 0 : index
    %c0_6 = arith.constant 0 : index
    %6 = vector.load %arg2[%c0_5, %c0_6] : memref<8x128xbf16, #tpu.memory_space<vmem>>, vector<8x128xbf16>
    %c0_7 = arith.constant 0 : index
    %c0_8 = arith.constant 0 : index
    %7 = vector.load %arg5[%c0_7, %c0_8] : memref<128x128xbf16, #tpu.memory_space<vmem>>, vector<128x128xbf16>
    %cst_9 = arith.constant dense<0.000000e+00> : vector<8x128xf32>
    %8 = tpu.matmul %6, %7, %cst_9 {dimension_numbers = #tpu.dot_dimension_numbers<[1], [0], [0], [1], [0, 0, 1, 1], [], []>} : vector<8x128xbf16>, vector<128x128xbf16>, vector<8x128xf32> -> vector<8x128xf32>
    %c0_10 = arith.constant 0 : index
    %c0_11 = arith.constant 0 : index
    %9 = vector.load %arg6[%c0_10, %c0_11] : memref<1x128xf32, #tpu.memory_space<vmem>>, vector<1x128xf32>
    %10 = vector.broadcast %9 : vector<1x128xf32> to vector<8x128xf32>
    %11 = arith.addf %8, %10 : vector<8x128xf32>
    %12 = arith.negf %11 : vector<8x128xf32>
    %13 = math.exp %12 : vector<8x128xf32>
    %cst_12 = arith.constant 1.000000e+00 : f32
    %14 = vector.broadcast %cst_12 : f32 to vector<8x128xf32>
    %15 = arith.addf %14, %13 : vector<8x128xf32>
    %16 = arith.divf %14, %15 : vector<8x128xf32>
    %17 = arith.mulf %11, %16 : vector<8x128xf32>
    %18 = arith.truncf %17 : vector<8x128xf32> to vector<8x128xbf16>
    %c0_13 = arith.constant 0 : index
    %c0_14 = arith.constant 0 : index
    %19 = vector.load %arg7[%c0_13, %c0_14] : memref<128x384xbf16, #tpu.memory_space<vmem>>, vector<128x384xbf16>
    %cst_15 = arith.constant dense<0.000000e+00> : vector<8x384xf32>
    %20 = tpu.matmul %18, %19, %cst_15 {dimension_numbers = #tpu.dot_dimension_numbers<[1], [0], [0], [1], [0, 0, 1, 1], [], []>} : vector<8x128xbf16>, vector<128x384xbf16>, vector<8x384xf32> -> vector<8x384xf32>
    %c0_16 = arith.constant 0 : index
    %c0_17 = arith.constant 0 : index
    %21 = vector.load %arg8[%c0_16, %c0_17] : memref<1x384xf32, #tpu.memory_space<vmem>>, vector<1x384xf32>
    %22 = vector.broadcast %21 : vector<1x384xf32> to vector<8x384xf32>
    %23 = arith.addf %20, %22 : vector<8x384xf32>
    %24 = arith.truncf %5 : vector<8x384xf32> to vector<8x384xbf16>
    %c0_18 = arith.constant 0 : index
    %c0_19 = arith.constant 0 : index
    %25 = vector.load %arg9[%c0_18, %c0_19] : memref<384x128xbf16, #tpu.memory_space<vmem>>, vector<384x128xbf16>
    %cst_20 = arith.constant dense<0.000000e+00> : vector<8x128xf32>
    %26 = tpu.matmul %24, %25, %cst_20 {dimension_numbers = #tpu.dot_dimension_numbers<[1], [0], [0], [1], [0, 0, 1, 1], [], []>} : vector<8x384xbf16>, vector<384x128xbf16>, vector<8x128xf32> -> vector<8x128xf32>
    %27 = arith.truncf %23 : vector<8x384xf32> to vector<8x384xbf16>
    %c0_21 = arith.constant 0 : index
    %c0_22 = arith.constant 0 : index
    %28 = vector.load %arg10[%c0_21, %c0_22] : memref<384x128xbf16, #tpu.memory_space<vmem>>, vector<384x128xbf16>
    %cst_23 = arith.constant dense<0.000000e+00> : vector<8x128xf32>
    %29 = tpu.matmul %27, %28, %cst_23 {dimension_numbers = #tpu.dot_dimension_numbers<[1], [0], [0], [1], [0, 0, 1, 1], [], []>} : vector<8x384xbf16>, vector<384x128xbf16>, vector<8x128xf32> -> vector<8x128xf32>
    %30 = arith.addf %26, %29 : vector<8x128xf32>
    %c0_24 = arith.constant 0 : index
    %c0_25 = arith.constant 0 : index
    %31 = vector.load %arg11[%c0_24, %c0_25] : memref<1x128xf32, #tpu.memory_space<vmem>>, vector<1x128xf32>
    %32 = vector.broadcast %31 : vector<1x128xf32> to vector<8x128xf32>
    %33 = arith.addf %30, %32 : vector<8x128xf32>
    %cst_26 = arith.constant 5.000000e-01 : f32
    %34 = vector.broadcast %cst_26 : f32 to vector<8x128xf32>
    %35 = arith.mulf %34, %33 : vector<8x128xf32>
    %cst_27 = arith.constant 0.707106769 : f32
    %36 = vector.broadcast %cst_27 : f32 to vector<8x128xf32>
    %37 = arith.mulf %33, %36 : vector<8x128xf32>
    %38 = math.erf %37 : vector<8x128xf32>
    %cst_28 = arith.constant 1.000000e+00 : f32
    %39 = vector.broadcast %cst_28 : f32 to vector<8x128xf32>
    %40 = arith.addf %39, %38 : vector<8x128xf32>
    %41 = arith.mulf %35, %40 : vector<8x128xf32>
    %c0_29 = arith.constant 0 : index
    %c0_30 = arith.constant 0 : index
    %42 = vector.load %arg12[%c0_29, %c0_30] : memref<128x128xf32, #tpu.memory_space<vmem>>, vector<128x128xf32>
    %cst_31 = arith.constant dense<0.000000e+00> : vector<8x128xf32>
    %43 = tpu.matmul %41, %42, %cst_31 {dimension_numbers = #tpu.dot_dimension_numbers<[1], [0], [0], [1], [0, 0, 1, 1], [], []>} : vector<8x128xf32>, vector<128x128xf32>, vector<8x128xf32> -> vector<8x128xf32>
    %c0_32 = arith.constant 0 : index
    %c0_33 = arith.constant 0 : index
    %44 = vector.load %arg13[%c0_32, %c0_33] : memref<1x128xf32, #tpu.memory_space<vmem>>, vector<1x128xf32>
    %45 = vector.broadcast %44 : vector<1x128xf32> to vector<8x128xf32>
    %46 = arith.addf %43, %45 : vector<8x128xf32>
    %c0_34 = arith.constant 0 : index
    %c0_35 = arith.constant 0 : index
    %47 = vector.load %arg14[%c0_34, %c0_35] : memref<8x128xf32, #tpu.memory_space<vmem>>, vector<8x128xf32>
    tpu.vector_store %arg14[%c0_34, %c0_35], %46 {strides = array<i32>} : memref<8x128xf32, #tpu.memory_space<vmem>>, vector<8x128xf32>,
    return
  }
  func.func @transform_0(%arg0: i32) -> (i32, i32) {
    %c0_i32 = arith.constant 0 : i32
    %c0_i32_0 = arith.constant 0 : i32
    return %arg0, %c0_i32 : i32, i32
  }
  func.func @transform_1(%arg0: i32) -> (i32, i32) {
    %c0_i32 = arith.constant 0 : i32
    %c0_i32_0 = arith.constant 0 : i32
    return %arg0, %c0_i32 : i32, i32
  }
  func.func @transform_2(%arg0: i32) -> (i32, i32) {
    %c0_i32 = arith.constant 0 : i32
    %c0_i32_0 = arith.constant 0 : i32
    %c0_i32_1 = arith.constant 0 : i32
    return %c0_i32, %c0_i32_0 : i32, i32
  }
  func.func @transform_3(%arg0: i32) -> (i32, i32) {
    %c0_i32 = arith.constant 0 : i32
    %c0_i32_0 = arith.constant 0 : i32
    %c0_i32_1 = arith.constant 0 : i32
    return %c0_i32, %c0_i32_0 : i32, i32
  }
  func.func @transform_4(%arg0: i32) -> (i32, i32) {
    %c0_i32 = arith.constant 0 : i32
    %c0_i32_0 = arith.constant 0 : i32
    %c0_i32_1 = arith.constant 0 : i32
    return %c0_i32, %c0_i32_0 : i32, i32
  }
  func.func @transform_5(%arg0: i32) -> (i32, i32) {
    %c0_i32 = arith.constant 0 : i32
    %c0_i32_0 = arith.constant 0 : i32
    %c0_i32_1 = arith.constant 0 : i32
    return %c0_i32, %c0_i32_0 : i32, i32
  }
  func.func @transform_6(%arg0: i32) -> (i32, i32) {
    %c0_i32 = arith.constant 0 : i32
    %c0_i32_0 = arith.constant 0 : i32
    %c0_i32_1 = arith.constant 0 : i32
    return %c0_i32, %c0_i32_0 : i32, i32
  }
  func.func @transform_7(%arg0: i32) -> (i32, i32) {
    %c0_i32 = arith.constant 0 : i32
    %c0_i32_0 = arith.constant 0 : i32
    %c0_i32_1 = arith.constant 0 : i32
    return %c0_i32, %c0_i32_0 : i32, i32
  }
  func.func @transform_8(%arg0: i32) -> (i32, i32) {
    %c0_i32 = arith.constant 0 : i32
    %c0_i32_0 = arith.constant 0 : i32
    %c0_i32_1 = arith.constant 0 : i32
    return %c0_i32, %c0_i32_0 : i32, i32
  }
  func.func @transform_9(%arg0: i32) -> (i32, i32) {
    %c0_i32 = arith.constant 0 : i32
    %c0_i32_0 = arith.constant 0 : i32
    %c0_i32_1 = arith.constant 0 : i32
    return %c0_i32, %c0_i32_0 : i32, i32
  }
  func.func @transform_10(%arg0: i32) -> (i32, i32) {
    %c0_i32 = arith.constant 0 : i32
    %c0_i32_0 = arith.constant 0 : i32
    %c0_i32_1 = arith.constant 0 : i32
    return %c0_i32, %c0_i32_0 : i32, i32
  }
  func.func @transform_11(%arg0: i32) -> (i32, i32) {
    %c0_i32 = arith.constant 0 : i32
    %c0_i32_0 = arith.constant 0 : i32
    %c0_i32_1 = arith.constant 0 : i32
    return %c0_i32, %c0_i32_0 : i32, i32
  }
  func.func @transform_12(%arg0: i32) -> (i32, i32) {
    %c0_i32 = arith.constant 0 : i32
    %c0_i32_0 = arith.constant 0 : i32
    %c0_i32_1 = arith.constant 0 : i32
    return %c0_i32, %c0_i32_0 : i32, i32
  }
  func.func @transform_13(%arg0: i32) -> (i32, i32) {
    %c0_i32 = arith.constant 0 : i32
    %c0_i32_0 = arith.constant 0 : i32
    return %arg0, %c0_i32 : i32, i32
  }
}

</mosaic_0001>

<bundles_post_ra>
// kernel: tpu_custom_call.1
= control target key start
LH: loop header
LB: loop body
LE: loop exit
PB: predicated region body
PF: predicated region fallthrough
CT: control target
= control target key end

     0   :  { %18 = vsyncpa [#allocation3], 0  ;;  %s3503_s0 = inlined_call_operand.hbm [shape: bf16[8,640], index: 0, kind: input, shape index: {}]   ;;  %s3504_s1 = inlined_call_operand.hbm [shape: bf16[8,128], index: 1, kind: input, shape index: {}]   ;;  %s3505_s2 = inlined_call_operand.hbm [shape: bf16[640,384], index: 2, kind: input, shape index: {}]   ;;  %s3506_s3 = inlined_call_operand.vmem [shape: f32[1,384], index: 3, kind: input, shape index: {}]   ;;  %s3507_s4 = inlined_call_operand.hbm [shape: bf16[128,128], index: 4, kind: input, shape index: {}]   ;;  %s3508_s5 = inlined_call_operand.vmem [shape: f32[1,128], index: 5, kind: input, shape index: {}]   ;;  %s3509_s6 = inlined_call_operand.hbm [shape: bf16[128,384], index: 6, kind: input, shape index: {}]   ;;  %s3510_s7 = inlined_call_operand.vmem [shape: f32[1,384], index: 7, kind: input, shape index: {}]   ;;  %s3511_s8 = inlined_call_operand.hbm [shape: bf16[384,128], index: 8, kind: input, shape index: {}]   ;;  %s3512_s9 = inlined_call_operand.hbm [shape: bf16[384,128], index: 9, kind: input, shape index: {}]   ;;  %s3513_s10 = inlined_call_operand.vmem [shape: f32[1,128], index: 10, kind: input, shape index: {}]   ;;  %s3514_s11 = inlined_call_operand.hbm [shape: f32[128,128], index: 11, kind: input, shape index: {}]   ;;  %s3515_s12 = inlined_call_operand.vmem [shape: f32[1,128], index: 12, kind: input, shape index: {}]   ;;  %s3516_s13 = inlined_call_operand.hbm [shape: f32[8,128], index: 13, kind: output, shape index: {}]  }
   0x1   :  { %19 = vsyncpa [#allocation6], 0 }
   0x2   :  { %20 = vsyncpa [#allocation9], 0 }
   0x3   :  { %21 = vsyncpa [#allocation12], 0 }
   0x4   :  { %22 = vsyncpa [#allocation15], 0 }
   0x5   :  { %23 = vsyncpa [#allocation4], 0  ;;  %s3249_s25 = smov [#allocation5]   ;;  %s3250_s27 = smov [#allocation8]  }
   0x6   :  { %s40_s26 = sshll.u32 %s3249_s25, 4  ;;  %s63_s28 = sshll.u32 %s3250_s27, 4  ;;  %s41_s26 = int_to_ptr.vmem [resolvable:$true] %s40_s26  ;;  %s64_s28 = int_to_ptr.vmem [resolvable:$true] %s63_s28 }
   0x7   :  { %s3065_s29 = scalar_lea.vmem %s41_s26, 64  ;;  %p3070_p1 = scmp.lt.s32.totalorder %s41_s26, %s41_s26 }
   0x8   :  { %p3066_p0 = scmp.ne.s32.totalorder %s41_s26, %s3065_s29  ;;  %p3071_p2 = scmp.lt.s32.totalorder %s3065_s29, %s3065_s29 }
   0xa   :  { %p3072_p3 = por %p3071_p2, %p3070_p1 }
   0xc   :  { %p3073_p4 = pnand %p3072_p3, %p3066_p0 }
   0xe   :  { %3076 = shalt.err (!%p3073_p4)
}
   0xf   :  { %43 = dma.hbm_to_vmem [thread:$0]  %s3504_s1, 64, %s41_s26, [#allocation6]  }
  0x10   :  { %s3085_s15 = scalar_lea.vmem %s64_s28, 1024  ;;  %p3090_p6 = scmp.lt.s32.totalorder %s64_s28, %s64_s28 }
  0x11   :  { %p3086_p5 = scmp.ne.s32.totalorder %s64_s28, %s3085_s15  ;;  %p3091_p7 = scmp.lt.s32.totalorder %s3085_s15, %s3085_s15 }
  0x13   :  { %p3092_p8 = por %p3091_p7, %p3090_p6 }
  0x15   :  { %p3093_p9 = pnand %p3092_p8, %p3086_p5 }
  0x17   :  { %3096 = shalt.err (!%p3093_p9)
}
  0x18   :  { %s3251_s16 = smov 64   ;;  %s3252_s17 = smov 4  }
  0x19   :  { %69 = dma.hbm_to_vmem [thread:$0]  %s3507_s4, 1024, %s64_s28, [#allocation9], %s3251_s16, %s3251_s16, %s3252_s17  }
  0x1a   :  { %s3253_s20 = smov [#allocation11]   ;;  %s3254_s22 = smov [#allocation2]  }
  0x1b   :  { %s91_s21 = sshll.u32 %s3253_s20, 4  ;;  %s30_s1 = sshll.u32 %s3254_s22, 4  ;;  %s92_s21 = int_to_ptr.vmem [resolvable:$true] %s91_s21  ;;  %s31_s1 = int_to_ptr.vmem [resolvable:$true] %s30_s1 }
  0x1c   :  { %s3105_s23 = scalar_lea.vmem %s92_s21, 3072  ;;  %p3110_p11 = scmp.lt.s32.totalorder %s92_s21, %s92_s21 }
  0x1d   :  { %p3106_p10 = scmp.ne.s32.totalorder %s92_s21, %s3105_s23  ;;  %p3111_p12 = scmp.lt.s32.totalorder %s3105_s23, %s3105_s23 }
  0x1f   :  { %p3112_p13 = por %p3111_p12, %p3110_p11 }
  0x21   :  { %p3113_p0 = pnand %p3112_p13, %p3106_p10 }
  0x23   :  { %3116 = shalt.err (!%p3113_p0)
}
  0x24   :  { %97 = dma.hbm_to_vmem [thread:$0]  %s3511_s8, 3072, %s92_s21, [#allocation12], %s3251_s16, %s3251_s16, %s3252_s17  }
  0x25   :  { %s3125_s4 = scalar_lea.vmem %s31_s1, 320  ;;  %p3130_p2 = scmp.lt.s32.totalorder %s31_s1, %s31_s1 }
  0x26   :  { %p3126_p1 = scmp.ne.s32.totalorder %s31_s1, %s3125_s4  ;;  %p3131_p3 = scmp.lt.s32.totalorder %s3125_s4, %s3125_s4 }
  0x28   :  { %p3132_p4 = por %p3131_p3, %p3130_p2 }
  0x2a   :  { %p3133_p5 = pnand %p3132_p4, %p3126_p1 }
  0x2c   :  { %3136 = shalt.err (!%p3133_p5)
}
  0x2d   :  { %33 = dma.hbm_to_vmem [thread:$0]  %s3503_s0, 320, %s31_s1, [#allocation3]  }
  0x2e   :  { %s3255_s28 = smov [#allocation7]  }
  0x2f   :  { %s49_s29 = sshll.u32 %s3255_s28, 4  ;;  %s50_s29 = int_to_ptr.vmem [resolvable:$true] %s49_s29 }
  0x30   :  { %s3145_s30 = scalar_lea.vmem %s50_s29, 15360  ;;  %p3150_p7 = scmp.lt.s32.totalorder %s50_s29, %s50_s29 }
  0x31   :  { %p3146_p6 = scmp.ne.s32.totalorder %s50_s29, %s3145_s30  ;;  %p3151_p8 = scmp.lt.s32.totalorder %s3145_s30, %s3145_s30 }
  0x33   :  { %p3152_p9 = por %p3151_p8, %p3150_p7 }
  0x35   :  { %p3153_p10 = pnand %p3152_p9, %p3146_p6 }
  0x37   :  { %3156 = shalt.err (!%p3153_p10)
}
  0x38   :  { %s3256_s8 = smov 192   ;;  %s3257_s14 = smov 12  }
  0x39   :  { %55 = dma.hbm_to_vmem [thread:$0]  %s3505_s2, 15360, %s50_s29, [#allocation6], %s3256_s8, %s3256_s8, %s3257_s14  }
  0x3a   :  { %s3258_s19 = smov [#allocation10]   ;;  %s3259_s0 = smov [#allocation13]  }
  0x3b   :  { %s77_s20 = sshll.u32 %s3258_s19, 4  ;;  %s103_s21 = sshll.u32 %s3259_s0, 4  ;;  %s78_s20 = int_to_ptr.vmem [resolvable:$true] %s77_s20  ;;  %s104_s21 = int_to_ptr.vmem [resolvable:$true] %s103_s21 }
  0x3c   :  { %s3165_s22 = scalar_lea.vmem %s78_s20, 3072  ;;  %p3170_p12 = scmp.lt.s32.totalorder %s78_s20, %s78_s20 }
  0x3d   :  { %p3166_p11 = scmp.ne.s32.totalorder %s78_s20, %s3165_s22  ;;  %p3171_p13 = scmp.lt.s32.totalorder %s3165_s22, %s3165_s22 }
  0x3f   :  { %p3172_p0 = por %p3171_p13, %p3170_p12 }
  0x41   :  { %p3173_p1 = pnand %p3172_p0, %p3166_p11 }
  0x43   :  { %3176 = shalt.err (!%p3173_p1)
}
  0x44   :  { %83 = dma.hbm_to_vmem [thread:$0]  %s3509_s6, 3072, %s78_s20, [#allocation9], %s3256_s8, %s3256_s8, %s3257_s14  }
  0x45   :  { %s3185_s24 = scalar_lea.vmem %s104_s21, 3072  ;;  %p3190_p3 = scmp.lt.s32.totalorder %s104_s21, %s104_s21 }
  0x46   :  { %p3186_p2 = scmp.ne.s32.totalorder %s104_s21, %s3185_s24  ;;  %p3191_p4 = scmp.lt.s32.totalorder %s3185_s24, %s3185_s24 }
  0x48   :  { %p3192_p5 = por %p3191_p4, %p3190_p3 }
  0x4a   :  { %p3193_p6 = pnand %p3192_p5, %p3186_p2 }
  0x4c   :  { %3196 = shalt.err (!%p3193_p6)
}
  0x4d   :  { %109 = dma.hbm_to_vmem [thread:$0]  %s3512_s9, 3072, %s104_s21, [#allocation12], %s3251_s16, %s3251_s16, %s3252_s17  }
  0x4e   :  { %s3260_s4 = smov [#allocation14]  }
  0x4f   :  { %s117_s26 = sshll.u32 %s3260_s4, 4  ;;  %s118_s26 = int_to_ptr.vmem [resolvable:$true] %s117_s26 }
  0x50   :  { %s3205_s27 = scalar_lea.vmem %s118_s26, 2048  ;;  %p3210_p8 = scmp.lt.s32.totalorder %s118_s26, %s118_s26 }
  0x51   :  { %p3206_p7 = scmp.ne.s32.totalorder %s118_s26, %s3205_s27  ;;  %p3211_p9 = scmp.lt.s32.totalorder %s3205_s27, %s3205_s27 }
  0x53   :  { %p3212_p10 = por %p3211_p9, %p3210_p8 }
  0x55   :  { %p3213_p11 = pnand %p3212_p10, %p3206_p7 }
  0x57   :  { %3216 = shalt.err (!%p3213_p11)
}
  0x58   :  { %s3261_s6 = smov 128   ;;  %s3262_s28 = smov 8  }
  0x59   :  { %123 = dma.hbm_to_vmem [thread:$0]  %s3514_s11, 2048, %s118_s26, [#allocation15], %s3261_s6, %s3261_s6, %s3262_s28  }
  0x5a   :  { %3237 = dma.done.wait [#allocation3], 320  }
  0x5b   :  { %3238 = vsyncadd [#allocation3], 4294966976 }
  0x5c   :  { %3239 = dma.done.wait [#allocation6], 15424  }
  0x5d   :  { %3240 = vsyncadd [#allocation6], 4294951872 }
  0x5e   :  { %3241 = dma.done.wait [#allocation9], 4096  }
  0x5f   :  { %3242 = vsyncadd [#allocation9], 4294963200 }
  0x60   :  { %3243 = dma.done.wait [#allocation12], 6144  }
  0x61   :  { %3244 = vsyncadd [#allocation12], 4294961152 }
  0x62   :  { %3245 = dma.done.wait [#allocation15], 2048  }
  0x63   :  { %3246 = vsyncadd [#allocation15], 4294965248  ;;  %v2798_v0 = vld [vmem:[#allocation7 + $0xac] ss:$12 sps:$4 sm:$0xff]   ;;  %v2800_v1 = vld [vmem:[#allocation7 + $0xa8] ss:$12 sps:$4 sm:$0xff]  }
  0x64   :  { %989 = vmatprep.subr.bf16.mxu0 %v2798_v0  ;;  %v2801_v2 = vld [vmem:[#allocation7 + $0x22c] ss:$12 sps:$4 sm:$0xff]   ;;  %v2803_v3 = vld [vmem:[#allocation7 + $0x228] ss:$12 sps:$4 sm:$0xff]   ;;  %v2806_v5 = vld [vmem:[#allocation7 + $0x90] ss:$12 sps:$4 sm:$0xff]  }
  0x65   :  { %990 = vmatpush1.bf16.msra.mxu0 %v2800_v1  ;;  %v2804_v4 = vld [vmem:[#allocation7 + $0x94] ss:$12 sps:$4 sm:$0xff]   ;;  %1030 = vmatprep.subr.bf16.mxu1 %v2801_v2  ;;  %v2809_v7 = vld [vmem:[#allocation7 + $0x210] ss:$12 sps:$4 sm:$0xff]   ;;  %v2812_v9 = vld [vmem:[#allocation7 + $0x78] ss:$12 sps:$4 sm:$0xff]  }
  0x66   :  { %v2807_v6 = vld [vmem:[#allocation7 + $0x214] ss:$12 sps:$4 sm:$0xff]   ;;  %1031 = vmatpush1.bf16.msra.mxu1 %v2803_v3  ;;  %991 = vmatprep.subr.bf16.mxu0 %v2804_v4  ;;  %v2810_v8 = vld [vmem:[#allocation7 + $0x7c] ss:$12 sps:$4 sm:$0xff]   ;;  %v2816_v11 = vld [vmem:[#allocation7 + $0x64] ss:$12 sps:$4 sm:$0xff]  }
  0x67   :  { %1032 = vmatprep.subr.bf16.mxu1 %v2807_v6  ;;  %v2813_v10 = vld [vmem:[#allocation7 + $0x1fc] ss:$12 sps:$4 sm:$0xff]   ;;  %v2815_v12 = vld [vmem:[#allocation7 + $0x1f8] ss:$12 sps:$4 sm:$0xff]   ;;  %v2818_v14 = vld [vmem:[#allocation7 + $0x60] ss:$12 sps:$4 sm:$0xff]  }
  0x68   :  { %v2819_v13 = vld [vmem:[#allocation7 + $0x1e4] ss:$12 sps:$4 sm:$0xff]   ;;  %v2822_v15 = vld [vmem:[#allocation7 + $0x4c] ss:$12 sps:$4 sm:$0xff]   ;;  %v2824_v18 = vld [vmem:[#allocation7 + $0x48] ss:$12 sps:$4 sm:$0xff]  }
  0x69   :  { %992 = vmatpush1.bf16.msra.mxu0 %v2806_v5  ;;  %v2821_v16 = vld [vmem:[#allocation7 + $0x1e0] ss:$12 sps:$4 sm:$0xff]   ;;  %v2827_v20 = vld [vmem:[#allocation7 + $0x1c8] ss:$12 sps:$4 sm:$0xff]   ;;  %v2830_v22 = vld [vmem:[#allocation7 + $0x30] ss:$12 sps:$4 sm:$0xff]  }
  0x6a   :  { %993 = vmatprep.subr.bf16.mxu0 %v2810_v8  ;;  %1033 = vmatpush1.bf16.msra.mxu1 %v2809_v7  ;;  %v2825_v17 = vld [vmem:[#allocation7 + $0x1cc] ss:$12 sps:$4 sm:$0xff]   ;;  %v2828_v19 = vld [vmem:[#allocation7 + $0x34] ss:$12 sps:$4 sm:$0xff]   ;;  %v2834_v23 = vld [vmem:[#allocation7 + $0x1c] ss:$12 sps:$4 sm:$0xff]  }
  0x6b   :  { %1034 = vmatprep.subr.bf16.mxu1 %v2813_v10  ;;  %v2831_v21 = vld [vmem:[#allocation7 + $0x1b4] ss:$12 sps:$4 sm:$0xff]   ;;  %v2833_v24 = vld [vmem:[#allocation7 + $0x1b0] ss:$12 sps:$4 sm:$0xff]   ;;  %v2836_v26 = vld [vmem:[#allocation7 + $0x18] ss:$12 sps:$4 sm:$0xff]  }
  0x6c   :  { %v2837_v25 = vld [vmem:[#allocation7 + $0x19c] ss:$12 sps:$4 sm:$0xff]   ;;  %v2840_v27 = vld [vmem:[#allocation7 + $0x4] ss:$12 sps:$4 sm:$0xff]   ;;  %v2842_v30 = vld [vmem:[#allocation7] ss:$12 sps:$4 sm:$0xff]  }
  0x6d   :  { %994 = vmatpush1.bf16.msra.mxu0 %v2812_v9  ;;  %v2839_v28 = vld [vmem:[#allocation7 + $0x198] ss:$12 sps:$4 sm:$0xff]   ;;  %v2845_v32 = vld [vmem:[#allocation7 + $0x180] ss:$12 sps:$4 sm:$0xff]   ;;  %v2848_v34 = vld [vmem:[#allocation7 + $0x168] ss:$12 sps:$4 sm:$0xff]  }
  0x6e   :  { %995 = vmatprep.subr.bf16.mxu0 %v2816_v11  ;;  %1035 = vmatpush1.bf16.msra.mxu1 %v2815_v12  ;;  %v2843_v29 = vld [vmem:[#allocation7 + $0x184] ss:$12 sps:$4 sm:$0xff]   ;;  %v2846_v31 = vld [vmem:[#allocation7 + $0x16c] ss:$12 sps:$4 sm:$0xff]   ;;  %v2852_v35 = vld [vmem:[#allocation7 + $0x154] ss:$12 sps:$4 sm:$0xff]  }
  0x6f   :  { %1036 = vmatprep.subr.bf16.mxu1 %v2819_v13  ;;  %v2849_v33 = vld [vmem:[#allocation7 + $0x2ec] ss:$12 sps:$4 sm:$0xff]   ;;  %v2851_v36 = vld [vmem:[#allocation7 + $0x2e8] ss:$12 sps:$4 sm:$0xff]   ;;  %v2854_v38 = vld [vmem:[#allocation7 + $0x150] ss:$12 sps:$4 sm:$0xff]  }
  0x70   :  { %v2855_v37 = vld [vmem:[#allocation7 + $0x2d4] ss:$12 sps:$4 sm:$0xff]   ;;  %v2858_v39 = vld [vmem:[#allocation7 + $0x13c] ss:$12 sps:$4 sm:$0xff]   ;;  %v2860_v42 = vld [vmem:[#allocation7 + $0x138] ss:$12 sps:$4 sm:$0xff]  }
  0x71   :  { %996 = vmatpush1.bf16.msra.mxu0 %v2818_v14  ;;  %v2857_v40 = vld [vmem:[#allocation7 + $0x2d0] ss:$12 sps:$4 sm:$0xff]   ;;  %v2863_v44 = vld [vmem:[#allocation7 + $0x2b8] ss:$12 sps:$4 sm:$0xff]   ;;  %v151_v46 = vld [vmem:[#allocation2] sm:$0xff]  ;;  %v3263_v13 = vmov 0  }
  0x72   :  { %997 = vmatprep.subr.bf16.mxu0 %v2822_v15  ;;  %1037 = vmatpush1.bf16.msra.mxu1 %v2821_v16  ;;  %v2861_v41 = vld [vmem:[#allocation7 + $0x2bc] ss:$12 sps:$4 sm:$0xff]   ;;  %v2864_v43 = vld [vmem:[#allocation7 + $0x124] ss:$12 sps:$4 sm:$0xff]   ;;  %v2866_v47 = vld [vmem:[#allocation7 + $0x120] ss:$12 sps:$4 sm:$0xff]   ;;  %v2287_v48 = vcombine.high %v151_v46, %v151_v46  ;;  %v3373_v5 = vcombine.low %v151_v46, %v151_v46 }
  0x73   :  { %1038 = vmatprep.subr.bf16.mxu1 %v2825_v17  ;;  %v2867_v45 = vld [vmem:[#allocation7 + $0x2a4] ss:$12 sps:$4 sm:$0xff]   ;;  %v2870_v49 = vld [vmem:[#allocation7 + $0x10c] ss:$12 sps:$4 sm:$0xff]   ;;  %v2872_v54 = vld [vmem:[#allocation7 + $0x108] ss:$12 sps:$4 sm:$0xff]  }
  0x74   :  { %v152_v50 = vld [vmem:[#allocation2 + $0x8] sm:$0xff]  ;;  %v2869_v51 = vld [vmem:[#allocation7 + $0x2a0] ss:$12 sps:$4 sm:$0xff]   ;;  %1021 = vmatprep.mubr.bf16.mxu0 %v2287_v48  ;;  %v2882_v59 = vld [vmem:[#allocation7 + $0xdc] ss:$12 sps:$4 sm:$0xff]   ;;  %vm3265_vm0 = vmmov 0  }
  0x75   :  { %998 = vmatpush1.bf16.msra.mxu0 %v2824_v18  ;;  %v3370_v52 = vcombine.high %v152_v50, %v152_v50  ;;  %v2873_v53 = vld [vmem:[#allocation7 + $0x28c] ss:$12 sps:$4 sm:$0xff]   ;;  %v2876_v55 = vld [vmem:[#allocation7 + $0xf4] ss:$12 sps:$4 sm:$0xff]   ;;  %v2878_v58 = vld [vmem:[#allocation7 + $0xf0] ss:$12 sps:$4 sm:$0xff]   ;;  %v3375_v8 = vcombine.low %v152_v50, %v152_v50 }
  0x76   :  { %999 = vmatprep.subr.bf16.mxu0 %v2828_v19  ;;  %1039 = vmatpush1.bf16.msra.mxu1 %v2827_v20  ;;  %v2875_v56 = vld [vmem:[#allocation7 + $0x288] ss:$12 sps:$4 sm:$0xff]   ;;  %v2881_v60 = vld [vmem:[#allocation7 + $0x270] ss:$12 sps:$4 sm:$0xff]   ;;  %v2884_v62 = vld [vmem:[#allocation7 + $0xd8] ss:$12 sps:$4 sm:$0xff]  }
  0x77   :  { %1040 = vmatprep.subr.bf16.mxu1 %v2831_v21  ;;  %1062 = vmatprep.mubr.bf16.mxu1 %v3370_v52  ;;  %v2879_v57 = vld [vmem:[#allocation7 + $0x274] ss:$12 sps:$4 sm:$0xff]   ;;  %v2885_v61 = vld [vmem:[#allocation7 + $0x25c] ss:$12 sps:$4 sm:$0xff]   ;;  %v2888_v63 = vld [vmem:[#allocation7 + $0xc4] ss:$12 sps:$4 sm:$0xff]  }
  0x78   :  { %v2887_v0 = vld [vmem:[#allocation7 + $0x258] ss:$12 sps:$4 sm:$0xff]   ;;  %v2890_v2 = vld [vmem:[#allocation7 + $0xc0] ss:$12 sps:$4 sm:$0xff]   ;;  %v2904_v6 = vld [vmem:[#allocation7 + $0x170] ss:$12 sps:$4 sm:$0xff]  }
  0x79   :  { %1000 = vmatpush1.bf16.msra.mxu0 %v2830_v22  ;;  %v2891_v1 = vld [vmem:[#allocation7 + $0x244] ss:$12 sps:$4 sm:$0xff]   ;;  %v2898_v3 = vld [vmem:[#allocation7 + $0x3ac] ss:$12 sps:$4 sm:$0xff]   ;;  %v2896_v7 = vld [vmem:[#allocation7 + $0x3a8] ss:$12 sps:$4 sm:$0xff]  }
  0x7a   :  { %1001 = vmatprep.subr.bf16.mxu0 %v2834_v23  ;;  %1041 = vmatpush1.bf16.msra.mxu1 %v2833_v24  ;;  %v2895_v4 = vld [vmem:[#allocation7 + $0x240] ss:$12 sps:$4 sm:$0xff]   ;;  %v2905_v10 = vld [vmem:[#allocation7 + $0xb0] ss:$12 sps:$4 sm:$0xff]   ;;  %v2909_v11 = vld [vmem:[#allocation7 + $0x158] ss:$12 sps:$4 sm:$0xff]  }
  0x7b   :  { %1042 = vmatprep.subr.bf16.mxu1 %v2837_v25  ;;  %v2903_v9 = vld [vmem:[#allocation7 + $0x394] ss:$12 sps:$4 sm:$0xff]   ;;  %v2901_v12 = vld [vmem:[#allocation7 + $0x390] ss:$12 sps:$4 sm:$0xff]   ;;  %v2910_v15 = vld [vmem:[#allocation7 + $0x98] ss:$12 sps:$4 sm:$0xff]  }
  0x7c   :  { %v2908_v14 = vld [vmem:[#allocation7 + $0x37c] ss:$12 sps:$4 sm:$0xff]   ;;  %v2914_v16 = vld [vmem:[#allocation7 + $0x140] ss:$12 sps:$4 sm:$0xff]   ;;  %v2906_v17 = vld [vmem:[#allocation7 + $0x378] ss:$12 sps:$4 sm:$0xff]  }
  0x7d   :  { %1002 = vmatpush1.bf16.msra.mxu0 %v2836_v26  ;;  %v2913_v18 = vld [vmem:[#allocation7 + $0x364] ss:$12 sps:$4 sm:$0xff]   ;;  %v2915_v19 = vld [vmem:[#allocation7 + $0x80] ss:$12 sps:$4 sm:$0xff]   ;;  %v2919_v20 = vld [vmem:[#allocation7 + $0x128] ss:$12 sps:$4 sm:$0xff]  }
  0x7e   :  { %1003 = vmatprep.subr.bf16.mxu0 %v2840_v27  ;;  %1043 = vmatpush1.bf16.msra.mxu1 %v2839_v28  ;;  %v2911_v21 = vld [vmem:[#allocation7 + $0x360] ss:$12 sps:$4 sm:$0xff]   ;;  %v2920_v23 = vld [vmem:[#allocation7 + $0x68] ss:$12 sps:$4 sm:$0xff]   ;;  %v2924_v24 = vld [vmem:[#allocation7 + $0x110] ss:$12 sps:$4 sm:$0xff]  }
  0x7f   :  { %1044 = vmatprep.subr.bf16.mxu1 %v2843_v29  ;;  %v2918_v22 = vld [vmem:[#allocation7 + $0x34c] ss:$12 sps:$4 sm:$0xff]   ;;  %v2916_v25 = vld [vmem:[#allocation7 + $0x348] ss:$12 sps:$4 sm:$0xff]   ;;  %v2925_v27 = vld [vmem:[#allocation7 + $0x50] ss:$12 sps:$4 sm:$0xff]  }
  0x80   :  { %v2923_v26 = vld [vmem:[#allocation7 + $0x334] ss:$12 sps:$4 sm:$0xff]   ;;  %v2929_v28 = vld [vmem:[#allocation7 + $0xf8] ss:$12 sps:$4 sm:$0xff]   ;;  %v2921_v29 = vld [vmem:[#allocation7 + $0x330] ss:$12 sps:$4 sm:$0xff]  }
  0x81   :  { %1004 = vmatpush1.bf16.msra.mxu0 %v2842_v30  ;;  %v2928_v30 = vld [vmem:[#allocation7 + $0x31c] ss:$12 sps:$4 sm:$0xff]   ;;  %v2944_v46 = vld [vmem:[#allocation7 + $0x2c0] ss:$12 sps:$4 sm:$0xff]   ;;  %s3266_s18 = smov [#allocation16]  }
  0x82   :  { %1005 = vmatprep.subr.bf16.mxu0 %v2846_v31  ;;  %1045 = vmatpush1.bf16.msra.mxu1 %v2845_v32  ;;  %v2930_v31 = vld [vmem:[#allocation7 + $0x38] ss:$12 sps:$4 sm:$0xff]   ;;  %v2934_v32 = vld [vmem:[#allocation7 + $0xe0] ss:$12 sps:$4 sm:$0xff]   ;;  %s2273_s19 = sshll.u32 %s3266_s18, 4  ;;  %s2274_s19 = int_to_ptr.vmem [resolvable:$true] %s2273_s19 }
  0x83   :  { %1046 = vmatprep.subr.bf16.mxu1 %v2849_v33  ;;  %v2926_v33 = vld [vmem:[#allocation7 + $0x318] ss:$12 sps:$4 sm:$0xff]   ;;  %v2949_v50 = vld [vmem:[#allocation7 + $0x380] ss:$12 sps:$4 sm:$0xff]   ;;  %p3222_p13 = scmp.lt.s32.totalorder %s2274_s19, %s2274_s19 }
  0x85   :  { %1006 = vmatpush2.bf16.msra.mxu0 %v2848_v34  ;;  %v2933_v34 = vld [vmem:[#allocation7 + $0x304] ss:$12 sps:$4 sm:$0xff]  }
  0x86   :  { %1007 = vmatprep.subr.bf16.mxu0 %v2852_v35  ;;  %1047 = vmatpush2.bf16.msra.mxu1 %v2851_v36  ;;  %v2935_v35 = vld [vmem:[#allocation7 + $0x20] ss:$12 sps:$4 sm:$0xff]   ;;  %v2939_v36 = vld [vmem:[#allocation7 + $0xc8] ss:$12 sps:$4 sm:$0xff]  }
  0x87   :  { %1048 = vmatprep.subr.bf16.mxu1 %v2855_v37  ;;  %v2931_v37 = vld [vmem:[#allocation7 + $0x300] ss:$12 sps:$4 sm:$0xff]  }
  0x89   :  { %1008 = vmatpush2.bf16.msra.mxu0 %v2854_v38  ;;  %v2937_v38 = vld [vmem:[#allocation7 + $0x2f0] ss:$12 sps:$4 sm:$0xff]  }
  0x8a   :  { %1009 = vmatprep.subr.bf16.mxu0 %v2858_v39  ;;  %1049 = vmatpush2.bf16.msra.mxu1 %v2857_v40  ;;  %v2940_v39 = vld [vmem:[#allocation7 + $0x8] ss:$12 sps:$4 sm:$0xff]   ;;  %v3380_v40 = vld [vmem:[#allocation2 + $0x10] ss:$0 sps:$4 sm:$0xff]  }
  0x8b   :  { %1050 = vmatprep.subr.bf16.mxu1 %v2861_v41  ;;  %v2938_v41 = vld [vmem:[#allocation7 + $0x230] ss:$12 sps:$4 sm:$0xff]  }
  0x8d   :  { %1010 = vmatpush2.bf16.msra.mxu0 %v2860_v42  ;;  %v2941_v42 = vld [vmem:[#allocation7 + $0x2d8] ss:$12 sps:$4 sm:$0xff]  }
  0x8e   :  { %1011 = vmatprep.subr.bf16.mxu0 %v2864_v43  ;;  %1051 = vmatpush2.bf16.msra.mxu1 %v2863_v44  ;;  %v2943_v43 = vld [vmem:[#allocation7 + $0x3b0] ss:$12 sps:$4 sm:$0xff]   ;;  %v3264_v44 = vmov 0.0  }
  0x8f   :  { %1052 = vmatprep.subr.bf16.mxu1 %v2867_v45  ;;  %v2942_v45 = vld [vmem:[#allocation7 + $0x218] ss:$12 sps:$4 sm:$0xff]  }
  0x91   :  { %1012 = vmatpush2.bf16.msra.mxu0 %v2866_v47  ;;  %v2946_v47 = vld [vmem:[#allocation7 + $0x398] ss:$12 sps:$4 sm:$0xff]  }
  0x92   :  { %1013 = vmatprep.subr.bf16.mxu0 %v2870_v49  ;;  %1053 = vmatpush2.bf16.msra.mxu1 %v2869_v51  ;;  %v2947_v49 = vld [vmem:[#allocation7 + $0x2a8] ss:$12 sps:$4 sm:$0xff]  }
  0x93   :  { %1054 = vmatprep.subr.bf16.mxu1 %v2873_v53  ;;  %v2948_v51 = vld [vmem:[#allocation7 + $0x1e8] ss:$12 sps:$4 sm:$0xff]  }
  0x94   :  { %v2952_v53 = vld [vmem:[#allocation7 + $0x368] ss:$12 sps:$4 sm:$0xff]  }
  0x95   :  { %1014 = vmatpush2.bf16.msra.mxu0 %v2872_v54  ;;  %v2951_v54 = vld [vmem:[#allocation7 + $0x1d0] ss:$12 sps:$4 sm:$0xff]  }
  0x96   :  { %1015 = vmatprep.subr.bf16.mxu0 %v2876_v55  ;;  %1055 = vmatpush2.bf16.msra.mxu1 %v2875_v56  ;;  %v2953_v55 = vld [vmem:[#allocation7 + $0x278] ss:$12 sps:$4 sm:$0xff]   ;;  %v2955_v56 = vld [vmem:[#allocation7 + $0x350] ss:$12 sps:$4 sm:$0xff]  }
  0x97   :  { %1056 = vmatprep.subr.bf16.mxu1 %v2879_v57  ;;  %v2954_v57 = vld [vmem:[#allocation7 + $0x1b8] ss:$12 sps:$4 sm:$0xff]  }
  0x99   :  { %1016 = vmatpush2.bf16.msra.mxu0 %v2878_v58  ;;  %v2956_v58 = vld [vmem:[#allocation7 + $0x260] ss:$12 sps:$4 sm:$0xff]  }
  0x9a   :  { %1017 = vmatprep.subr.bf16.mxu0 %v2882_v59  ;;  %1057 = vmatpush2.bf16.msra.mxu1 %v2881_v60  ;;  %v2958_v59 = vld [vmem:[#allocation7 + $0x338] ss:$12 sps:$4 sm:$0xff]   ;;  %v2957_v60 = vld [vmem:[#allocation7 + $0x1a0] ss:$12 sps:$4 sm:$0xff]  }
  0x9b   :  { %1058 = vmatprep.subr.bf16.mxu1 %v2885_v61  ;;  %v2959_v61 = vld [vmem:[#allocation7 + $0x248] ss:$12 sps:$4 sm:$0xff]  }
  0x9d   :  { %1018 = vmatpush2.bf16.msra.mxu0 %v2884_v62  ;;  %v2961_v62 = vld [vmem:[#allocation7 + $0x320] ss:$12 sps:$4 sm:$0xff]  }
  0x9e   :  { %1019 = vmatprep.subr.bf16.mxu0 %v2888_v63  ;;  %1059 = vmatpush2.bf16.msra.mxu1 %v2887_v0  ;;  %v2960_v63 = vld [vmem:[#allocation7 + $0x188] ss:$12 sps:$4 sm:$0xff]  }
  0x9f   :  { %1060 = vmatprep.subr.bf16.mxu1 %v2891_v1  ;;  %v2963_v0 = vld [vmem:[#allocation7 + $0x308] ss:$12 sps:$4 sm:$0xff]   ;;  %v2962_v1 = vld [vmem:[#allocation8 + $0x38] sm:$0xff]  }
  0xa1   :  { %1020 = vmatpush2.bf16.msra.mxu0 %v2890_v2  ;;  %v2964_v2 = vld [vmem:[#allocation8 + $0x30] sm:$0xff]  }
  0xa2   :  { %1071 = vmatprep.subr.bf16.mxu0 %v2898_v3  ;;  %1061 = vmatpush2.bf16.msra.mxu1 %v2895_v4  ;;  %v2965_v3 = vld [vmem:[#allocation8 + $0x28] sm:$0xff]   ;;  %v2966_v4 = vld [vmem:[#allocation8 + $0x20] sm:$0xff]  }
  0xa3   :  { %2495 = vmatprep.subr.bf16.mxu1 %v2904_v6  ;;  %v2968_v6 = vld [vmem:[#allocation8 + $0x10] sm:$0xff]  }
  0xa4   :  { %1022 = vmatmul.mubr.bf16.vlgmr.msra.gmra.mxu0 %v3373_v5 }
  0xa5   :  { %1072 = vmatpush1.bf16.msra.mxu0 %v2896_v7  ;;  %1103 = vmatprep.mubr.bf16.mxu0 %v3263_v13  ;;  %v2969_v7 = vld [vmem:[#allocation8 + $0x8] sm:$0xff]  }
  0xa6   :  { %1063 = vmatmul.mubr.bf16.vlgmr.msra.gmra.mxu1 %v3375_v8  ;;  %1073 = vmatprep.subr.bf16.mxu0 %v2903_v9  ;;  %v1232_v9 = vld [vmem:[#allocation5] sm:$0xf] }
  0xa7   :  { %2496 = vmatpush3.bf16.msra.mxu1 %v2905_v10  ;;  %1144 = vmatprep.mubr.bf16.mxu1 %v2287_v48  ;;  %v2945_v48 = vld [vmem:[#allocation7 + $0x200] ss:$12 sps:$4 sm:$0xff]  }
  0xa8   :  { %2497 = vmatprep.subr.bf16.mxu1 %v2909_v11  ;;  %v2973_v10 = vld [vmem:[#allocation10 + $0xac] ss:$12 sps:$4 sm:$0xff]   ;;  %v2971_v11 = vld [vmem:[#allocation10 + $0xa8] ss:$12 sps:$4 sm:$0xff]  }
  0xa9   :  { %1074 = vmatpush1.bf16.msra.mxu0 %v2901_v12  ;;  %v2974_v12 = vld [vmem:[#allocation10 + $0xb0] ss:$12 sps:$4 sm:$0xff]  }
  0xaa   :  { %1075 = vmatprep.subr.bf16.mxu0 %v2908_v14  ;;  %v2975_v14 = vld [vmem:[#allocation10 + $0x90] ss:$12 sps:$4 sm:$0xff]  }
  0xab   :  { %2498 = vmatpush3.bf16.msra.mxu1 %v2910_v15  ;;  %v2978_v15 = vld [vmem:[#allocation10 + $0x98] ss:$12 sps:$4 sm:$0xff]  }
  0xac   :  { %2499 = vmatprep.subr.bf16.mxu1 %v2914_v16  ;;  %v2981_v16 = vld [vmem:[#allocation10 + $0x7c] ss:$12 sps:$4 sm:$0xff]  }
  0xad   :  { %1076 = vmatpush1.bf16.msra.mxu0 %v2906_v17  ;;  %v2979_v17 = vld [vmem:[#allocation10 + $0x78] ss:$12 sps:$4 sm:$0xff]  }
  0xae   :  { %1077 = vmatprep.subr.bf16.mxu0 %v2913_v18  ;;  %v2982_v18 = vld [vmem:[#allocation10 + $0x80] ss:$12 sps:$4 sm:$0xff]  }
  0xaf   :  { %2500 = vmatpush3.bf16.msra.mxu1 %v2915_v19  ;;  %v316_v19 = vlaneseq }
  0xb0   :  { %2501 = vmatprep.subr.bf16.mxu1 %v2919_v20  ;;  %v2985_v20 = vld [vmem:[#allocation10 + $0x64] ss:$12 sps:$4 sm:$0xff]  }
  0xb1   :  { %1078 = vmatpush1.bf16.msra.mxu0 %v2911_v21  ;;  %v2983_v21 = vld [vmem:[#allocation10 + $0x60] ss:$12 sps:$4 sm:$0xff]  }
  0xb2   :  { %1079 = vmatprep.subr.bf16.mxu0 %v2918_v22  ;;  %v2986_v22 = vld [vmem:[#allocation10 + $0x68] ss:$12 sps:$4 sm:$0xff]  }
  0xb3   :  { %2502 = vmatpush3.bf16.msra.mxu1 %v2920_v23  ;;  %v3414_v23 = vshrl.u32 %v316_v19, 7 }
  0xb4   :  { %2503 = vmatprep.subr.bf16.mxu1 %v2924_v24  ;;  %v2989_v24 = vld [vmem:[#allocation10 + $0x4c] ss:$12 sps:$4 sm:$0xff]  }
  0xb5   :  { %1080 = vmatpush1.bf16.msra.mxu0 %v2916_v25  ;;  %v2987_v25 = vld [vmem:[#allocation10 + $0x48] ss:$12 sps:$4 sm:$0xff]  }
  0xb6   :  { %1081 = vmatprep.subr.bf16.mxu0 %v2923_v26  ;;  %v2990_v26 = vld [vmem:[#allocation10 + $0x50] ss:$12 sps:$4 sm:$0xff]  }
  0xb7   :  { %2504 = vmatpush3.bf16.msra.mxu1 %v2925_v27  ;;  %v318_v27 = vsub.s32 0, %v3414_v23 }
  0xb8   :  { %2505 = vmatprep.subr.bf16.mxu1 %v2929_v28  ;;  %v2993_v28 = vld [vmem:[#allocation10 + $0x34] ss:$12 sps:$4 sm:$0xff]  }
  0xb9   :  { %1082 = vmatpush1.bf16.msra.mxu0 %v2921_v29  ;;  %v314_v29 = vld [vmem:[%s3506_s3] sm:$0x7] }
  0xba   :  { %1083 = vmatprep.subr.bf16.mxu0 %v2928_v30  ;;  %v2991_v30 = vld [vmem:[#allocation10 + $0x30] ss:$12 sps:$4 sm:$0xff]  }
  0xbb   :  { %2506 = vmatpush3.bf16.msra.mxu1 %v2930_v31  ;;  %v2994_v31 = vld [vmem:[#allocation10 + $0x38] ss:$12 sps:$4 sm:$0xff]  }
  0xbc   :  { %2507 = vmatprep.subr.bf16.mxu1 %v2934_v32  ;;  %v322_v32 = vsub.s32 1, %v3414_v23 }
  0xbd   :  { %1084 = vmatpush1.bf16.msra.mxu0 %v2926_v33  ;;  %v319_v33 = vrot.slane %v314_v29, %v318_v27 }
  0xbe   :  { %1085 = vmatprep.subr.bf16.mxu0 %v2933_v34  ;;  %v2997_v34 = vld [vmem:[#allocation10 + $0x1c] ss:$12 sps:$4 sm:$0xff]  }
  0xbf   :  { %2508 = vmatpush3.bf16.msra.mxu1 %v2935_v35  ;;  %v2995_v35 = vld [vmem:[#allocation10 + $0x18] ss:$12 sps:$4 sm:$0xff]  }
  0xc0   :  { %2509 = vmatprep.subr.bf16.mxu1 %v2939_v36  ;;  %v2998_v36 = vld [vmem:[#allocation10 + $0x20] ss:$12 sps:$4 sm:$0xff]  }
  0xc1   :  { %1086 = vmatpush1.bf16.msra.mxu0 %v2931_v37  ;;  %v323_v37 = vrot.slane %v314_v29, %v322_v32 }
  0xc2   :  { %2517 = vmatprep.subr.bf16.mxu0 %v2937_v38 }
  0xc3   :  { %2510 = vmatpush3.bf16.msra.mxu1 %v2940_v39 }
  0xc4   :  { %1104 = vmatmul.mubr.bf16.vlgmr.msra.gmra.mxu0 %v3380_v40  ;;  %2645 = vmatprep.subr.bf16.mxu1 %v3264_v44 }
  0xc5   :  { %2518 = vmatpush3.bf16.msra.mxu0 %v2938_v41  ;;  %1184 = vmatprep.mubr.bf16.mxu0 %v3370_v52  ;;  %v2950_v52 = vld [vmem:[#allocation7 + $0x290] ss:$12 sps:$4 sm:$0xff]  }
  0xc6   :  { %2519 = vmatprep.subr.bf16.mxu0 %v2941_v42  ;;  %1145 = vmatmul.mubr.bf16.vlgmr.msra.gmra.mxu1 %v3373_v5  ;;  %v2967_v5 = vld [vmem:[#allocation8 + $0x18] sm:$0xff]  }
  0xc7   :  { %2646 = vmatpush3.bf16.msra.mxu1 %v2943_v43  ;;  %2661 = vmatprep.mubr.msk.bf16.mxu1 %vm3265_vm0, %v3264_v44  ;;  %v2999_v43 = vld [vmem:[#allocation10] ss:$12 sps:$4 sm:$0xff]  }
  0xc8   :  { %2647 = vmatprep.subr.bf16.mxu1 %v3264_v44 }
  0xc9   :  { %2520 = vmatpush3.bf16.msra.mxu0 %v2942_v45  ;;  %v3002_v45 = vld [vmem:[#allocation10 + $0x8] ss:$12 sps:$4 sm:$0xff]  }
  0xca   :  { %2521 = vmatprep.subr.bf16.mxu0 %v2944_v46 }
  0xcb   :  { %2648 = vmatpush3.bf16.msra.mxu1 %v2946_v47 }
  0xcc   :  { %2649 = vmatprep.subr.bf16.mxu1 %v3264_v44 }
  0xcd   :  { %2522 = vmatpush3.bf16.msra.mxu0 %v2945_v48 }
  0xce   :  { %2523 = vmatprep.subr.bf16.mxu0 %v2947_v49 }
  0xcf   :  { %2650 = vmatpush3.bf16.msra.mxu1 %v2949_v50 }
  0xd0   :  { %2651 = vmatprep.subr.bf16.mxu1 %v3264_v44 }
  0xd1   :  { %2524 = vmatpush3.bf16.msra.mxu0 %v2948_v51 }
  0xd2   :  { %2525 = vmatprep.subr.bf16.mxu0 %v2950_v52 }
  0xd3   :  { %2652 = vmatpush3.bf16.msra.mxu1 %v2952_v53 }
  0xd4   :  { %2653 = vmatprep.subr.bf16.mxu1 %v3264_v44 }
  0xd5   :  { %2526 = vmatpush3.bf16.msra.mxu0 %v2951_v54  ;;  %v3004_v54 = vld [vmem:[#allocation13 + $0x78] sm:$0xff]  }
  0xd6   :  { %2527 = vmatprep.subr.bf16.mxu0 %v2953_v55 }
  0xd7   :  { %2654 = vmatpush3.bf16.msra.mxu1 %v2955_v56 }
  0xd8   :  { %2655 = vmatprep.subr.bf16.mxu1 %v3264_v44 }
  0xd9   :  { %2528 = vmatpush3.bf16.msra.mxu0 %v2954_v57 }
  0xda   :  { %2529 = vmatprep.subr.bf16.mxu0 %v2956_v58 }
  0xdb   :  { %2656 = vmatpush3.bf16.msra.mxu1 %v2958_v59 }
  0xdc   :  { %2657 = vmatprep.subr.bf16.mxu1 %v3264_v44 }
  0xdd   :  { %2530 = vmatpush3.bf16.msra.mxu0 %v2957_v60 }
  0xde   :  { %2531 = vmatprep.subr.bf16.mxu0 %v2959_v61 }
  0xdf   :  { %2658 = vmatpush3.bf16.msra.mxu1 %v2961_v62 }
  0xe0   :  { %2659 = vmatprep.subr.bf16.mxu1 %v3264_v44 }
  0xe1   :  { %2532 = vmatpush3.bf16.msra.mxu0 %v2960_v63 }
  0xe2   :  { %2665 = vmatprep.subr.bf16.mxu0 %v3264_v44 }
  0xe3   :  { %2660 = vmatpush3.bf16.msra.mxu1 %v2963_v0 }
  0xe4   :  { %1185 = vmatmul.mubr.bf16.vlgmr.msra.gmra.mxu0 %v3375_v8  ;;  %v2970_v8 = vld [vmem:[#allocation8] sm:$0xff]   ;;  %1529 = vmatprep.subr.bf16.mxu1 %v2973_v10 }
  0xe5   :  { %2666 = vmatpush3.bf16.msra.mxu0 %v2962_v1  ;;  %2681 = vmatprep.mubr.msk.bf16.mxu0 %vm3265_vm0, %v3264_v44 }
  0xe6   :  { %2667 = vmatprep.subr.bf16.mxu0 %v3264_v44  ;;  %2662 = vmatmul.mubr.bf16.vlgmr.msra.gmra.mxu1 %v3380_v40  ;;  %v3001_v40 = vld [vmem:[#allocation10 + $0x4] ss:$12 sps:$4 sm:$0xff]  }
  0xe7   :  { %1561 = vmatprep.mubr.bf16.mxu1 %v3263_v13  ;;  %1530 = vmatpush1.bf16.msra.mxu1 %v2971_v11  ;;  %v2977_v13 = vld [vmem:[#allocation10 + $0x94] ss:$12 sps:$4 sm:$0xff]  }
  0xe8   :  { %1531 = vmatprep.subr.bf16.mxu1 %v2977_v13 }
  0xe9   :  { %2668 = vmatpush3.bf16.msra.mxu0 %v2964_v2  ;;  %v326_v2 = vsub.s32 2, %v3414_v23  ;;  %v3030_v23 = vld [vmem:[#allocation11 + $0xb0] sm:$0xff]  }
  0xea   :  { %2669 = vmatprep.subr.bf16.mxu0 %v3264_v44 }
  0xeb   :  { %1532 = vmatpush1.bf16.msra.mxu1 %v2975_v14 }
  0xec   :  { %1533 = vmatprep.subr.bf16.mxu1 %v2981_v16  ;;  %v2411_v16 = vld [vmem:[%s3508_s5] ss:$0 sm:$0xff] }
  0xed   :  { %2670 = vmatpush3.bf16.msra.mxu0 %v2965_v3  ;;  %v327_v3 = vrot.slane %v314_v29, %v326_v2  ;;  %v3003_v29 = vld [vmem:[#allocation13 + $0xb8] sm:$0xff]  }
  0xee   :  { %2671 = vmatprep.subr.bf16.mxu0 %v3264_v44 }
  0xef   :  { %1534 = vmatpush1.bf16.msra.mxu1 %v2979_v17 }
  0xf0   :  { %1535 = vmatprep.subr.bf16.mxu1 %v2985_v20 }
  0xf1   :  { %2672 = vmatpush3.bf16.msra.mxu0 %v2966_v4 }
  0xf2   :  { %2673 = vmatprep.subr.bf16.mxu0 %v3264_v44 }
  0xf3   :  { %1536 = vmatpush1.bf16.msra.mxu1 %v2983_v21 }
  0xf4   :  { %1537 = vmatprep.subr.bf16.mxu1 %v2989_v24 }
  0xf5   :  { %2674 = vmatpush3.bf16.msra.mxu0 %v2967_v5 }
  0xf6   :  { %2675 = vmatprep.subr.bf16.mxu0 %v3264_v44 }
  0xf7   :  { %1538 = vmatpush1.bf16.msra.mxu1 %v2987_v25 }
  0xf8   :  { %1539 = vmatprep.subr.bf16.mxu1 %v2993_v28 }
  0xf9   :  { %2676 = vmatpush3.bf16.msra.mxu0 %v2968_v6 }
  0xfa   :  { %2677 = vmatprep.subr.bf16.mxu0 %v3264_v44 }
  0xfb   :  { %1540 = vmatpush1.bf16.msra.mxu1 %v2991_v30  ;;  %v3005_v30 = vld [vmem:[#allocation13 + $0x38] sm:$0xff]  }
  0xfc   :  { %1541 = vmatprep.subr.bf16.mxu1 %v2997_v34  ;;  %v3006_v34 = vld [vmem:[#allocation13 + $0xb0] sm:$0xff]  }
  0xfd   :  { %2678 = vmatpush3.bf16.msra.mxu0 %v2969_v7 }
  0xfe   :  { %2679 = vmatprep.subr.bf16.mxu0 %v3264_v44 }
  0xff   :  { %1542 = vmatpush1.bf16.msra.mxu1 %v2995_v35  ;;  %v3008_v35 = vld [vmem:[#allocation13 + $0x30] sm:$0xff]  }
 0x100   :  { %1543 = vmatprep.subr.bf16.mxu1 %v3001_v40  ;;  %v3012_v40 = vld [vmem:[#allocation13 + $0xa0] sm:$0xff]  }
 0x101   :  { %2680 = vmatpush3.bf16.msra.mxu0 %v2970_v8 }
 0x102   :  { %2685 = vmatprep.subr.bf16.mxu0 %v3264_v44 }
 0x103   :  { %1544 = vmatpush1.bf16.msra.mxu1 %v2999_v43  ;;  %v3015_v43 = vld [vmem:[#allocation13 + $0x98] sm:$0xff]  }
 0x104   :  { %2682 = vmatmul.mubr.bf16.vlgmr.msra.gmra.mxu0 %v1232_v9  ;;  %2566 = vmatprep.subr.bf16.mxu1 %v3004_v54  ;;  %v3026_v54 = vld [vmem:[#allocation13] sm:$0xff]  }
 0x105   :  { %2701 = vmatprep.mubr.msk.bf16.mxu0 %vm3265_vm0, %v3264_v44  ;;  %2686 = vmatpush3.bf16.msra.mxu0 %v2974_v12 }
 0x106   :  { %2687 = vmatprep.subr.bf16.mxu0 %v3264_v44 }
 0x109   :  { %2688 = vmatpush3.bf16.msra.mxu0 %v2978_v15 }
 0x10a   :  { %2689 = vmatprep.subr.bf16.mxu0 %v3264_v44 }
 0x10d   :  { %2690 = vmatpush3.bf16.msra.mxu0 %v2982_v18 }
 0x10e   :  { %2691 = vmatprep.subr.bf16.mxu0 %v3264_v44 }
 0x111   :  { %2692 = vmatpush3.bf16.msra.mxu0 %v2986_v22 }
 0x112   :  { %2693 = vmatprep.subr.bf16.mxu0 %v3264_v44 }
 0x115   :  { %2694 = vmatpush3.bf16.msra.mxu0 %v2990_v26 }
 0x116   :  { %2695 = vmatprep.subr.bf16.mxu0 %v3264_v44 }
 0x119   :  { %2696 = vmatpush3.bf16.msra.mxu0 %v2994_v31 }
 0x11a   :  { %2697 = vmatprep.subr.bf16.mxu0 %v3264_v44 }
 0x11d   :  { %2698 = vmatpush3.bf16.msra.mxu0 %v2998_v36  ;;  %v3010_v36 = vld [vmem:[#allocation13 + $0x68] sm:$0xff]  }
 0x11e   :  { %2699 = vmatprep.subr.bf16.mxu0 %v3264_v44 }
 0x121   :  { %2700 = vmatpush3.bf16.msra.mxu0 %v3002_v45  ;;  %v3017_v45 = vld [vmem:[#allocation13 + $0x18] sm:$0xff]  }
 0x122   :  { %2705 = vmatprep.subr.bf16.mxu0 %v3264_v44 }
 0x164   :  { %v1023_v38 = vpop.f32.mrf.mxu0 }
 0x165   :  { %v1024_v39 = vadd.f32 %v1023_v38, %v319_v33  ;;  %v3007_v33 = vld [vmem:[#allocation13 + $0x70] sm:$0xff]   ;;  %v3011_v38 = vld [vmem:[#allocation13 + $0x28] sm:$0xff]  }
 0x166   :  { %v1025_v41 = vpop.f32.mrf.mxu0  ;;  %v1064_v42 = vpop.f32.mrf.mxu1 }
 0x167   :  { %v1026_v46 = vadd.f32 %v1025_v41, %v323_v37  ;;  %v1065_v47 = vadd.f32 %v1064_v42, %v1024_v39  ;;  %v3009_v37 = vld [vmem:[#allocation13 + $0xa8] sm:$0xff]   ;;  %v3013_v39 = vld [vmem:[#allocation13 + $0x60] sm:$0xff]   ;;  %v3016_v42 = vld [vmem:[#allocation13 + $0x58] sm:$0xff]  }
 0x168   :  { %v1027_v48 = vpop.f32.mrf.mxu0  ;;  %v1066_v49 = vpop.f32.mrf.mxu1  ;;  %v3014_v41 = vld [vmem:[#allocation13 + $0x20] sm:$0xff]  }
 0x169   :  { %v1067_v50 = vadd.f32 %v1066_v49, %v1026_v46  ;;  %v3019_v46 = vld [vmem:[#allocation13 + $0x50] sm:$0xff]   ;;  %v3022_v49 = vld [vmem:[#allocation13 + $0x48] sm:$0xff]  }
 0x16a   :  { %v1028_v51 = vpop.f32.mrf.mxu0  ;;  %v1068_v52 = vpop.f32.mrf.mxu1  ;;  %v3020_v48 = vld [vmem:[#allocation13 + $0x10] sm:$0xff]  }
 0x16b   :  { %v3023_v51 = vld [vmem:[#allocation13 + $0x8] sm:$0xff]   ;;  %v3024_v52 = vld [vmem:[#allocation13 + $0x80] sm:$0xff]  }
 0x16c   :  { %v1069_v53 = vpop.f32.mrf.mxu1 }
 0x16d   :  { %v3025_v53 = vld [vmem:[#allocation13 + $0x40] sm:$0xff]  }
 0x184   :  { %v1105_v55 = vpop.f32.mrf.mxu0 }
 0x185   :  { %v3430_v56 = vadd.f32 %v1105_v55, %v1065_v47  ;;  %v3018_v47 = vld [vmem:[#allocation13 + $0x90] sm:$0xff]   ;;  %v3028_v55 = vld [vmem:[#allocation11 + $0x78] sm:$0xff]  }
 0x186   :  { %v1107_v57 = vpop.f32.mrf.mxu0  ;;  %v2511_v58 = vpop.f32.mrf.mxu1 }
 0x187   :  { %v3432_v59 = vadd.f32 %v1107_v57, %v1067_v50  ;;  %v3021_v50 = vld [vmem:[#allocation13 + $0x88] sm:$0xff]  }
 0x188   :  { %v1109_v60 = vpop.f32.mrf.mxu0  ;;  %v2512_v61 = vpop.f32.mrf.mxu1  ;;  %v1384_v57 = vld [vmem:[%s3510_s7] sm:$0x7] }
 0x189   :  { %v2513_v62 = vadd.f32 %v2512_v61, %v2511_v58  ;;  %v1397_v58 = vrot.slane %v1384_v57, %v326_v2  ;;  %v1389_v60 = vrot.slane %v1384_v57, %v318_v27  ;;  %v1393_v61 = vrot.slane %v1384_v57, %v322_v32  ;;  %v3029_v2 = vld [vmem:[#allocation11 + $0x38] sm:$0xff]   ;;  %v3031_v32 = vld [vmem:[#allocation11 + $0x70] sm:$0xff]  }
 0x18a   :  { %v1110_v63 = vpop.f32.mrf.mxu0  ;;  %v2514_v0 = vpop.f32.mrf.mxu1 }
 0x18b   :  { %v1147_v5 = vadd.f32 %v2513_v62, %v327_v3 }
 0x18c   :  { %v2515_v1 = vpop.f32.mrf.mxu1 }
 0x1a4   :  { %v2533_v4 = vpop.f32.mrf.mxu0 }
 0x1a6   :  { %v2534_v6 = vpop.f32.mrf.mxu0  ;;  %v1226_v7 = vpop.f32.mrf.mxu1 }
 0x1a7   :  { %v2535_v8 = vadd.f32 %v2534_v6, %v2533_v4 }
 0x1a8   :  { %v2536_v9 = vpop.f32.mrf.mxu0  ;;  %v2663_v10 = vpop.f32.mrf.mxu1 }
 0x1a9   :  { %v1187_v11 = vadd.f32 %v2535_v8, %v1147_v5  ;;  %v3027_v5 = vld [vmem:[#allocation11 + $0xb8] sm:$0xff]  }
 0x1aa   :  { %v2537_v12 = vpop.f32.mrf.mxu0  ;;  %v1229_v13 = vpop.f32.mrf.mxu1 }
 0x1ab   :  { %v3437_v14 = vadd.f32 %v1226_v7, %v1187_v11  ;;  %v1611_v13 = vpack.c.bf16 %v3432_v59, %v3432_v59  ;;  %v3038_v59 = vld [vmem:[#allocation11 + $0x20] sm:$0xff]  }
 0x1ac   :  { %v2664_v15 = vpop.f32.mrf.mxu1 }
 0x1ad   :  { %v3032_v15 = vld [vmem:[#allocation11 + $0x30] sm:$0xff]  }
 0x1c4   :  { %v1338_v17 = vpop.f32.mrf.mxu0 }
 0x1c5   :  { %v1339_v18 = vadd.f32 %v2411_v16, %v1338_v17  ;;  %v3033_v16 = vld [vmem:[#allocation11 + $0xa8] sm:$0xff]  }
 0x1c6   :  { %v2683_v19 = vpop.f32.mrf.mxu0  ;;  %v3034_v17 = vld [vmem:[#allocation11 + $0x68] sm:$0xff]  }
 0x1c7   :  { %v2420_v20 = vmul.f32 -1.442695, %v1339_v18  ;;  %v3036_v19 = vld [vmem:[#allocation11 + $0xa0] sm:$0xff]  }
 0x1c8   :  { %v1341_v21 = vpop.f32.mrf.mxu0 }
 0x1c9   :  { %3051 = vpow2.f32 %v2420_v20  ;;  %v3037_v20 = vld [vmem:[#allocation11 + $0x60] sm:$0xff]   ;;  %v3039_v21 = vld [vmem:[#allocation11 + $0x98] sm:$0xff]  }
 0x1ca   :  { %v2684_v22 = vpop.f32.mrf.mxu0 }
 0x1cb   :  { %v3040_v22 = vld [vmem:[#allocation11 + $0x58] sm:$0xff]  }
 0x1d6   :  { %v3052_v24 = vpop.eup %3051 }
 0x1d7   :  { %v1347_v25 = vadd.f32 1.0, %v3052_v24  ;;  %v3041_v24 = vld [vmem:[#allocation11 + $0x18] sm:$0xff]  }
 0x1d9   :  { %3053 = vrcp.f32 %v1347_v25  ;;  %v3042_v25 = vld [vmem:[#allocation11 + $0x90] sm:$0xff]  }
 0x1e6   :  { %v3054_v26 = vpop.eup %3053 }
 0x1e7   :  { %v1350_v28 = vmul.f32 %v3054_v26, %v1339_v18  ;;  %v3035_v18 = vld [vmem:[#allocation11 + $0x28] sm:$0xff]   ;;  %v3043_v26 = vld [vmem:[#allocation11 + $0x50] sm:$0xff]  }
 0x1e9   :  { %v1351_v31 = vpack.c.bf16 %v1350_v28, %v1350_v28  ;;  %v3044_v28 = vld [vmem:[#allocation11 + $0x10] sm:$0xff]  }
 0x1eb   :  { %1562 = vmatmul.mubr.bf16.vlgmr.msra.gmra.mxu1 %v1351_v31  ;;  %2702 = vmatmul.mubr.bf16.vlgmr.msra.gmra.mxu0 %v1351_v31  ;;  %v3047_v31 = vld [vmem:[#allocation11 + $0x8] sm:$0xff]  }
 0x1ec   :  { %2706 = vmatpush3.bf16.msra.mxu0 %v3003_v29  ;;  %2567 = vmatpush3.bf16.msra.mxu1 %v3005_v30  ;;  %v3045_v29 = vld [vmem:[#allocation11 + $0x88] sm:$0xff]  }
 0x1ed   :  { %2707 = vmatprep.subr.bf16.mxu0 %v3264_v44  ;;  %2568 = vmatprep.subr.bf16.mxu1 %v3007_v33  ;;  %v3046_v30 = vld [vmem:[#allocation11 + $0x48] sm:$0xff]   ;;  %v3048_v33 = vld [vmem:[#allocation11 + $0x80] sm:$0xff]  }
 0x1ee   :  { %2721 = vmatprep.mubr.msk.bf16.mxu0 %vm3265_vm0, %v3264_v44 }
 0x1f0   :  { %2708 = vmatpush3.bf16.msra.mxu0 %v3006_v34  ;;  %2569 = vmatpush3.bf16.msra.mxu1 %v3008_v35  ;;  %v3049_v34 = vld [vmem:[#allocation11 + $0x40] sm:$0xff]  }
 0x1f1   :  { %2709 = vmatprep.subr.bf16.mxu0 %v3264_v44  ;;  %2570 = vmatprep.subr.bf16.mxu1 %v3010_v36  ;;  %v3050_v35 = vld [vmem:[#allocation11] sm:$0xff]   ;;  %v1612_v36 = vpack.c.bf16 %v3437_v14, %v3437_v14  ;;  %v2186_v14 = vld [vmem:[#allocation14 + $0x68] sm:$0xff] }
 0x1f4   :  { %2710 = vmatpush3.bf16.msra.mxu0 %v3009_v37  ;;  %2571 = vmatpush3.bf16.msra.mxu1 %v3011_v38  ;;  %v1610_v37 = vpack.c.bf16 %v3430_v56, %v3430_v56  ;;  %v2188_v38 = vld [vmem:[#allocation14 + $0x78] sm:$0xff] }
 0x1f5   :  { %2711 = vmatprep.subr.bf16.mxu0 %v3264_v44  ;;  %2572 = vmatprep.subr.bf16.mxu1 %v3013_v39  ;;  %v2187_v39 = vld [vmem:[#allocation14 + $0x70] sm:$0xff]  ;;  %v2184_v56 = vld [vmem:[#allocation14 + $0x58] sm:$0xff] }
 0x1f8   :  { %2712 = vmatpush3.bf16.msra.mxu0 %v3012_v40  ;;  %2573 = vmatpush3.bf16.msra.mxu1 %v3014_v41  ;;  %v2185_v40 = vld [vmem:[#allocation14 + $0x60] sm:$0xff]  ;;  %v2183_v41 = vld [vmem:[#allocation14 + $0x50] sm:$0xff] }
 0x1f9   :  { %2713 = vmatprep.subr.bf16.mxu0 %v3264_v44  ;;  %2574 = vmatprep.subr.bf16.mxu1 %v3016_v42  ;;  %v2182_v42 = vld [vmem:[#allocation14 + $0x48] sm:$0xff] }
 0x1fc   :  { %2714 = vmatpush3.bf16.msra.mxu0 %v3015_v43  ;;  %2575 = vmatpush3.bf16.msra.mxu1 %v3017_v45  ;;  %v2181_v43 = vld [vmem:[#allocation14 + $0x40] sm:$0xff]  ;;  %v2180_v45 = vld [vmem:[#allocation14 + $0x38] sm:$0xff] }
 0x1fd   :  { %2715 = vmatprep.subr.bf16.mxu0 %v3264_v44  ;;  %2576 = vmatprep.subr.bf16.mxu1 %v3019_v46  ;;  %v2179_v46 = vld [vmem:[#allocation14 + $0x30] sm:$0xff] }
 0x200   :  { %2716 = vmatpush3.bf16.msra.mxu0 %v3018_v47  ;;  %2577 = vmatpush3.bf16.msra.mxu1 %v3020_v48  ;;  %v2178_v47 = vld [vmem:[#allocation14 + $0x28] sm:$0xff]  ;;  %v2177_v48 = vld [vmem:[#allocation14 + $0x20] sm:$0xff] }
 0x201   :  { %2717 = vmatprep.subr.bf16.mxu0 %v3264_v44  ;;  %2578 = vmatprep.subr.bf16.mxu1 %v3022_v49  ;;  %v2176_v49 = vld [vmem:[#allocation14 + $0x18] sm:$0xff] }
 0x204   :  { %2718 = vmatpush3.bf16.msra.mxu0 %v3021_v50  ;;  %2579 = vmatpush3.bf16.msra.mxu1 %v3023_v51  ;;  %v2175_v50 = vld [vmem:[#allocation14 + $0x10] sm:$0xff]  ;;  %v2174_v51 = vld [vmem:[#allocation14 + $0x8] sm:$0xff] }
 0x205   :  { %2719 = vmatprep.subr.bf16.mxu0 %v3264_v44  ;;  %2580 = vmatprep.subr.bf16.mxu1 %v3025_v53 }
 0x208   :  { %2720 = vmatpush3.bf16.msra.mxu0 %v3024_v52  ;;  %2581 = vmatpush3.bf16.msra.mxu1 %v3026_v54  ;;  %v2173_v52 = vld [vmem:[#allocation14] sm:$0xff] }
 0x209   :  { %2725 = vmatprep.subr.bf16.mxu0 %v3264_v44  ;;  %2597 = vmatprep.subr.bf16.mxu1 %v3028_v55 }
 0x2ab   :  { %v1563_v62 = vpop.f32.mrf.mxu1  ;;  %v1604_v63 = vpop.f32.mrf.mxu0 }
 0x2ac   :  { %v1605_v0 = vadd.f32 %v1604_v63, %v1397_v58  ;;  %v1564_v1 = vadd.f32 %v1563_v62, %v1389_v60 }
 0x2ad   :  { %v1565_v3 = vpop.f32.mrf.mxu1  ;;  %v2703_v4 = vpop.f32.mrf.mxu0 }
 0x2ae   :  { %v1663_v6 = vpack.c.bf16 %v1605_v0, %v1605_v0  ;;  %v1566_v7 = vadd.f32 %v1565_v3, %v1393_v61  ;;  %v1661_v11 = vpack.c.bf16 %v1564_v1, %v1564_v1 }
 0x2af   :  { %v1567_v8 = vpop.f32.mrf.mxu1  ;;  %v1607_v9 = vpop.f32.mrf.mxu0 }
 0x2b0   :  { %v1662_v10 = vpack.c.bf16 %v1566_v7, %v1566_v7  ;;  %2722 = vmatmul.mubr.bf16.vlgmr.msra.gmra.mxu0 %v1663_v6 }
 0x2b1   :  { %2726 = vmatpush3.bf16.msra.mxu0 %v3027_v5  ;;  %v1568_v27 = vpop.f32.mrf.mxu1  ;;  %v2704_v12 = vpop.f32.mrf.mxu0  ;;  %2741 = vmatprep.mubr.msk.bf16.mxu0 %vm3265_vm0, %v3264_v44 }
 0x2b2   :  { %1888 = vmatprep.mubr.bf16.mxu1 %v1662_v10  ;;  %2727 = vmatprep.subr.bf16.mxu0 %v3264_v44  ;;  %v2493_v10 = vld [vmem:[%s3513_s10] ss:$0 sm:$0xff]  ;;  %s3217_s10 = scalar_lea.vmem %s2274_s19, 128 }
 0x2b3   :  { %1889 = vmatmul.mubr.bf16.vlgmr.msra.gmra.mxu1 %v1661_v11  ;;  %p3218_p12 = scmp.ne.s32.totalorder %s2274_s19, %s3217_s10  ;;  %p3223_p0 = scmp.lt.s32.totalorder %s3217_s10, %s3217_s10 }
 0x2b4   :  { %2598 = vmatpush3.bf16.msra.mxu1 %v3029_v2  ;;  %2112 = vmatprep.mubr.bf16.mxu1 %v1611_v13 }
 0x2b5   :  { %2728 = vmatpush3.bf16.msra.mxu0 %v3030_v23  ;;  %2599 = vmatprep.subr.bf16.mxu1 %v3031_v32  ;;  %p3224_p1 = por %p3223_p0, %p3222_p13 }
 0x2b6   :  { %2729 = vmatprep.subr.bf16.mxu0 %v3264_v44 }
 0x2b7   :  { %p3225_p2 = pnand %p3224_p1, %p3218_p12 }
 0x2b8   :  { %2600 = vmatpush3.bf16.msra.mxu1 %v3032_v15 }
 0x2b9   :  { %2730 = vmatpush3.bf16.msra.mxu0 %v3033_v16  ;;  %2601 = vmatprep.subr.bf16.mxu1 %v3034_v17  ;;  %v2494_v16 = vld [vmem:[%s3515_s12] ss:$0 sm:$0xff] }
 0x2ba   :  { %2731 = vmatprep.subr.bf16.mxu0 %v3264_v44 }
 0x2bc   :  { %2602 = vmatpush3.bf16.msra.mxu1 %v3035_v18 }
 0x2bd   :  { %2732 = vmatpush3.bf16.msra.mxu0 %v3036_v19  ;;  %2603 = vmatprep.subr.bf16.mxu1 %v3037_v20 }
 0x2be   :  { %2733 = vmatprep.subr.bf16.mxu0 %v3264_v44 }
 0x2c0   :  { %2604 = vmatpush3.bf16.msra.mxu1 %v3038_v59 }
 0x2c1   :  { %2734 = vmatpush3.bf16.msra.mxu0 %v3039_v21  ;;  %2605 = vmatprep.subr.bf16.mxu1 %v3040_v22 }
 0x2c2   :  { %2735 = vmatprep.subr.bf16.mxu0 %v3264_v44 }
 0x2c4   :  { %2606 = vmatpush3.bf16.msra.mxu1 %v3041_v24 }
 0x2c5   :  { %2736 = vmatpush3.bf16.msra.mxu0 %v3042_v25  ;;  %2607 = vmatprep.subr.bf16.mxu1 %v3043_v26 }
 0x2c6   :  { %2737 = vmatprep.subr.bf16.mxu0 %v3264_v44 }
 0x2c8   :  { %2608 = vmatpush3.bf16.msra.mxu1 %v3044_v28 }
 0x2c9   :  { %2738 = vmatpush3.bf16.msra.mxu0 %v3045_v29  ;;  %2609 = vmatprep.subr.bf16.mxu1 %v3046_v30 }
 0x2ca   :  { %2739 = vmatprep.subr.bf16.mxu0 %v3264_v44 }
 0x2cc   :  { %2610 = vmatpush3.bf16.msra.mxu1 %v3047_v31 }
 0x2cd   :  { %2740 = vmatpush3.bf16.msra.mxu0 %v3048_v33  ;;  %2611 = vmatprep.subr.bf16.mxu1 %v3049_v34 }
 0x2d0   :  { %2612 = vmatpush3.bf16.msra.mxu1 %v3050_v35  ;;  %2742 = vmatmul.mubr.bf16.vlgmr.msra.gmra.mxu0 %v1612_v36 }
 0x2d1   :  { %2745 = vmatprep.subr.mxu1 %v3264_v44 }
 0x2d3   :  { %2113 = vmatmul.mubr.bf16.vlgmr.msra.gmra.mxu1 %v1610_v37 }
 0x2d4   :  { %2777 = vmatprep.mubr.msk.f32.mxu1 %vm3265_vm0, %v3264_v44  ;;  %2746 = vmatpush3.msra.mxu1 %v2188_v38 }
 0x2d5   :  { %2747 = vmatprep.subr.mxu1 %v3264_v44 }
 0x2d6   :  { %2748 = vmatpush3.msra.mxu1 %v2187_v39 }
 0x2d7   :  { %2749 = vmatprep.subr.mxu1 %v3264_v44 }
 0x2d8   :  { %2750 = vmatpush3.msra.mxu1 %v2186_v14 }
 0x2d9   :  { %2751 = vmatprep.subr.mxu1 %v3264_v44 }
 0x2da   :  { %2752 = vmatpush3.msra.mxu1 %v2185_v40 }
 0x2db   :  { %2753 = vmatprep.subr.mxu1 %v3264_v44 }
 0x2dc   :  { %2754 = vmatpush3.msra.mxu1 %v2184_v56 }
 0x2dd   :  { %2755 = vmatprep.subr.mxu1 %v3264_v44 }
 0x2de   :  { %2756 = vmatpush3.msra.mxu1 %v2183_v41 }
 0x2df   :  { %2757 = vmatprep.subr.mxu1 %v3264_v44 }
 0x2e0   :  { %2758 = vmatpush3.msra.mxu1 %v2182_v42 }
 0x2e1   :  { %2759 = vmatprep.subr.mxu1 %v3264_v44 }
 0x2e2   :  { %2760 = vmatpush3.msra.mxu1 %v2181_v43 }
 0x2e3   :  { %2761 = vmatprep.subr.mxu1 %v3264_v44 }
 0x2e4   :  { %2762 = vmatpush3.msra.mxu1 %v2180_v45 }
 0x2e5   :  { %2763 = vmatprep.subr.mxu1 %v3264_v44 }
 0x2e6   :  { %2764 = vmatpush3.msra.mxu1 %v2179_v46 }
 0x2e7   :  { %2765 = vmatprep.subr.mxu1 %v3264_v44 }
 0x2e8   :  { %2766 = vmatpush3.msra.mxu1 %v2178_v47 }
 0x2e9   :  { %2767 = vmatprep.subr.mxu1 %v3264_v44 }
 0x2ea   :  { %2768 = vmatpush3.msra.mxu1 %v2177_v48 }
 0x2eb   :  { %2769 = vmatprep.subr.mxu1 %v3264_v44 }
 0x2ec   :  { %2770 = vmatpush3.msra.mxu1 %v2176_v49 }
 0x2ed   :  { %2771 = vmatprep.subr.mxu1 %v3264_v44 }
 0x2ee   :  { %2772 = vmatpush3.msra.mxu1 %v2175_v50 }
 0x2ef   :  { %2773 = vmatprep.subr.mxu1 %v3264_v44 }
 0x2f0   :  { %2774 = vmatpush3.msra.mxu1 %v2174_v51 }
 0x2f1   :  { %2775 = vmatprep.subr.mxu1 %v3264_v44 }
 0x2f2   :  { %2776 = vmatpush3.msra.mxu1 %v2173_v52 }
 0x370   :  { %v1930_v53 = vpop.f32.mrf.mxu0 }
 0x372   :  { %v2723_v54 = vpop.f32.mrf.mxu0 }
 0x373   :  { %v2582_v55 = vpop.f32.mrf.mxu1 }
 0x374   :  { %v1933_v57 = vpop.f32.mrf.mxu0 }
 0x375   :  { %v2583_v58 = vpop.f32.mrf.mxu1 }
 0x376   :  { %v2724_v60 = vpop.f32.mrf.mxu0  ;;  %v2584_v0 = vadd.f32 %v2583_v58, %v2582_v55 }
 0x377   :  { %v2585_v61 = vpop.f32.mrf.mxu1 }
 0x378   :  { %v1931_v6 = vadd.f32 %v2584_v0, %v1930_v53 }
 0x379   :  { %v2586_v62 = vpop.f32.mrf.mxu1 }
 0x390   :  { %v2154_v63 = vpop.f32.mrf.mxu0 }
 0x392   :  { %v2743_v1 = vpop.f32.mrf.mxu0 }
 0x393   :  { %v2613_v3 = vpop.f32.mrf.mxu1 }
 0x394   :  { %v2157_v4 = vpop.f32.mrf.mxu0 }
 0x395   :  { %v2614_v5 = vpop.f32.mrf.mxu1 }
 0x396   :  { %v2615_v7 = vadd.f32 %v2614_v5, %v2613_v3  ;;  %v2744_v8 = vpop.f32.mrf.mxu0 }
 0x397   :  { %v2616_v9 = vpop.f32.mrf.mxu1 }
 0x398   :  { %v2115_v44 = vadd.f32 %v2615_v7, %v1931_v6 }
 0x399   :  { %v2617_v2 = vpop.f32.mrf.mxu1 }
 0x39a   :  { %v2155_v11 = vadd.f32 %v2154_v63, %v2115_v44 }
 0x39c   :  { %v2167_v27 = vadd.f32 %v2493_v10, %v2155_v11 }
 0x39e   :  { %v2169_v12 = vmul.f32 0.70710677, %v2167_v27  ;;  %v2168_v32 = vmul.f32 0.5, %v2167_v27 }
 0x3a0   :  { %3055 = verf.f32 %v2169_v12 }
 0x3ad   :  { %v3056_v23 = vpop.eup %3055 }
 0x3ae   :  { %v2171_v13 = vadd.f32 1.0, %v3056_v23 }
 0x3b0   :  { %v2172_v15 = vmul.f32 %v2171_v13, %v2168_v32 }
 0x3b2   :  { %2778 = vmatmul.mubr.f32.vlgmr.msra.gmra.mxu1 %v2172_v15 }
 0x472   :  { %v2262_v17 = vpop.f32.mrf.mxu1 }
 0x473   :  { %v2263_v18 = vadd.f32 %v2494_v16, %v2262_v17 }
 0x474   :  { %v2779_v19 = vpop.f32.mrf.mxu1 }
 0x475   :  { %2266 = vst [vmem:[#allocation16] sm:$0xff] %v2263_v18 }
 0x476   :  { %3228 = shalt.err (!%p3225_p2)
}
 0x477   :  { %2276 = dma.vmem_to_hbm [thread:$0]  %s2274_s19, 128, %s3516_s13, [#allocation4]  }
 0x478   :  { %3247 = dma.done.wait [#allocation4], 128  }
 0x479   :  { %3248 = vsyncadd [#allocation4], 4294967168 }
 0x47a   :  { %2280 = vsyncpa [#allocation3], 1 }
 0x47b   :  { %2281 = vsyncpa [#allocation6], 1 }
 0x47c   :  { %2282 = vsyncpa [#allocation9], 1 }
 0x47d   :  { %2283 = vsyncpa [#allocation12], 1 }
 0x47e   :  { %2284 = vsyncpa [#allocation15], 1 }
 0x47f   :  { %2285 = vsyncpa [#allocation4], 1 }

</bundles_post_ra>
